<compile_context>
chip_gen: v7x
topology: tpu7x:2x2x1
jax: 0.10.0
libtpu: 0.0.40
codegen_flags: <defaults>
</compile_context>

<pallas_src>
import functools

import jax
import jax.numpy as jnp
from jax import lax
from jax.experimental import pallas as pl
from jax.experimental.pallas import tpu as pltpu


# Set to jnp.bfloat16 on v5e/v6e to trade a little precision for higher MXU / HBM
# throughput (accumulation stays f32 via preferred_element_type).  f32 keeps exact
# parity with the PyTorch reference.
_DOT_DTYPE = jnp.float32
_VMEM_LIMIT = 32 * 1024 * 1024   # explicit scoped-VMEM budget (safe on v5e/v6e/v7x)


def _cparams(*sem):
    return pltpu.CompilerParams(dimension_semantics=sem,
                                vmem_limit_bytes=_VMEM_LIMIT)


def _spatial_tile(hw, target=2048):
    """Largest lane tile (multiple of 128) dividing hw, capped at `target` lanes."""
    if hw <= target or hw % 128 != 0:
        return hw                      # full extent -> always a legal block shape
    t = target - (target % 128)
    while hw % t:
        t -= 128
    return t


# ----------------------------- Pallas kernels -------------------------------

def _conv1x1_kernel(x_ref, w_ref, scale_ref, bias_ref, o_ref, *, apply_relu):
    """1x1 conv as (Cout,Cin)@(Cin,T) matmul + folded-BN affine + optional ReLU."""
    y = jnp.dot(w_ref[...].astype(_DOT_DTYPE), x_ref[0].astype(_DOT_DTYPE),
                preferred_element_type=jnp.float32)
    y = y * scale_ref[...] + bias_ref[...]
    if apply_relu:
        y = jnp.maximum(y, 0.0)
    o_ref[0] = y.astype(o_ref.dtype)


def _concat_conv1x1_kernel(y1_ref, y2_ref, y3_ref, y4_ref, y5_ref,
                           w_ref, scale_ref, bias_ref, r_ref, o_ref):
    """conv_last fused with torch.cat: accumulate the (Cout,5*hid)x(5*hid,T) product
    as five partial dots (one per branch), then BN affine + ReLU + shortcut (y0)."""
    acc = jnp.zeros((o_ref.shape[1], o_ref.shape[2]), jnp.float32)
    for s, y_ref in enumerate((y1_ref, y2_ref, y3_ref, y4_ref, y5_ref)):
        acc = acc + jnp.dot(w_ref[s].astype(_DOT_DTYPE),
                            y_ref[0].astype(_DOT_DTYPE),
                            preferred_element_type=jnp.float32)
    y = acc * scale_ref[...] + bias_ref[...]
    y = jnp.maximum(y, 0.0) + r_ref[0]
    o_ref[0] = y.astype(o_ref.dtype)


def _add_conv3x3_kernel(a_ref, b_ref, w_ref, scale_ref, bias_ref, o_ref,
                        pad_ref, patch_ref, *, h, w):
    """Fused (a + b) -> 3x3 'same' conv -> folded-BN affine -> ReLU.

    The summed input is written once into a zero-padded, flattened VMEM buffer
      pad = [0]*(w+1) ++ flat(a+b) ++ [0]*(w+1)
    so each of the 9 taps is a *contiguous* lane slice of it (row under/overflow
    lands in the zero head/tail; column wrap between rows is fixed by a lane mask).
    The 9 masked taps are packed into an im2col scratch and contracted with the
    (Cout, 9*Cin) weight in a single lane-dense MXU matmul."""
    cin = a_ref.shape[1]
    hw = h * w

    pad_ref[...] = jnp.zeros_like(pad_ref)
    pad_ref[:, w + 1:w + 1 + hw] = a_ref[0] + b_ref[0]   # b broadcasts if its block is (cin, 1)

    col = lax.broadcasted_iota(jnp.int32, (1, hw), 1) % w
    not_left = col >= 1          # valid output columns for a dx = -1 tap
    not_right = col <= w - 2     # valid output columns for a dx = +1 tap

    for dy in range(3):
        for dx in range(3):
            start = (dy - 1) * w + (dx - 1) + (w + 1)
            tap = pad_ref[:, start:start + hw]
            if dx == 0:
                tap = jnp.where(not_left, tap, 0.0)
            elif dx == 2:
                tap = jnp.where(not_right, tap, 0.0)
            t = dy * 3 + dx
            patch_ref[t * cin:(t + 1) * cin, :] = tap

    y = jnp.dot(w_ref[...].astype(_DOT_DTYPE),
                patch_ref[...].astype(_DOT_DTYPE),
                preferred_element_type=jnp.float32)
    y = y * scale_ref[...] + bias_ref[...]
    o_ref[0] = jnp.maximum(y, 0.0).astype(o_ref.dtype)


def _gap_conv1x1_kernel(x_ref, w_ref, o_ref, *, inv_hw):
    """Global average pool over the flattened spatial axis fused with the
    bias-free 1x1 conv of the pool5 branch."""
    mean = jnp.sum(x_ref[0], axis=1, keepdims=True) * inv_hw          # (cin, 1)
    o_ref[0] = jnp.dot(w_ref[...], mean,
                       preferred_element_type=jnp.float32).astype(o_ref.dtype)


# ----------------------------- Pallas wrappers -------------------------------

def conv1x1_fused(x, w, scale, bias, apply_relu):
    """x: (N, Cin, HW) -> (N, Cout, HW). Fused 1x1 conv + BN affine (+ ReLU)."""
    n, cin, hw = x.shape
    cout = w.shape[0]
    t = _spatial_tile(hw)
    return pl.pallas_call(
        functools.partial(_conv1x1_kernel, apply_relu=apply_relu),
        out_shape=jax.ShapeDtypeStruct((n, cout, hw), x.dtype),
        grid=(n, hw // t),
        in_specs=[
            pl.BlockSpec((1, cin, t), lambda i, j: (i, 0, j)),
            pl.BlockSpec((cout, cin), lambda i, j: (0, 0)),
            pl.BlockSpec((cout, 1), lambda i, j: (0, 0)),
            pl.BlockSpec((cout, 1), lambda i, j: (0, 0)),
        ],
        out_specs=pl.BlockSpec((1, cout, t), lambda i, j: (i, 0, j)),
        compiler_params=_cparams("parallel", "parallel"),
    )(x, w, scale.reshape(cout, 1), bias.reshape(cout, 1))


def concat_conv1x1_fused(ys, w5, scale, bias, residual):
    """conv_last fused with the channel concat.  ys = [y1..y5], each (N, hid, HW);
    w5: (5, Cout, hid).  Returns relu(BN(conv(cat(ys)))) + residual."""
    n, hid, hw = ys[0].shape
    cout = w5.shape[1]
    t = _spatial_tile(hw)
    y_spec = pl.BlockSpec((1, hid, t), lambda i, j: (i, 0, j))
    return pl.pallas_call(
        _concat_conv1x1_kernel,
        out_shape=jax.ShapeDtypeStruct((n, cout, hw), ys[0].dtype),
        grid=(n, hw // t),
        in_specs=[y_spec] * 5 + [
            pl.BlockSpec((5, cout, hid), lambda i, j: (0, 0, 0)),
            pl.BlockSpec((cout, 1), lambda i, j: (0, 0)),
            pl.BlockSpec((cout, 1), lambda i, j: (0, 0)),
            pl.BlockSpec((1, cout, t), lambda i, j: (i, 0, j)),
        ],
        out_specs=pl.BlockSpec((1, cout, t), lambda i, j: (i, 0, j)),
        compiler_params=_cparams("parallel", "parallel"),
    )(*ys, w5, scale.reshape(cout, 1), bias.reshape(cout, 1), residual)


def add_conv3x3_fused(a, b, w_flat, scale, bias, h, w):
    """relu(BN(conv3x3(a + b))) with 'same' padding, padding fused into the kernel.

    a: (N, Cin, H*W); b: (N, Cin, H*W) or (N, Cin, 1) (broadcast add -- used for the
    global-pool branch, whose 1x1 -> HxW align_corners upsample is a broadcast)."""
    n, cin, hw = a.shape
    cout = w_flat.shape[0]
    b_hw = b.shape[2]
    pad_len = hw + 2 * (w + 1)
    return pl.pallas_call(
        functools.partial(_add_conv3x3_kernel, h=h, w=w),
        out_shape=jax.ShapeDtypeStruct((n, cout, hw), a.dtype),
        grid=(n,),
        in_specs=[
            pl.BlockSpec((1, cin, hw), lambda i: (i, 0, 0)),
            pl.BlockSpec((1, cin, b_hw), lambda i: (i, 0, 0)),
            pl.BlockSpec((cout, 9 * cin), lambda i: (0, 0)),
            pl.BlockSpec((cout, 1), lambda i: (0, 0)),
            pl.BlockSpec((cout, 1), lambda i: (0, 0)),
        ],
        out_specs=pl.BlockSpec((1, cout, hw), lambda i: (i, 0, 0)),
        scratch_shapes=[
            pltpu.VMEM((cin, pad_len), jnp.float32),      # zero-padded flattened sum
            pltpu.VMEM((9 * cin, hw), jnp.float32),       # im2col patch buffer
        ],
        compiler_params=_cparams("parallel"),
    )(a, b, w_flat, scale.reshape(cout, 1), bias.reshape(cout, 1))


def gap_conv1x1(x, w):
    """AdaptiveAvgPool2d(1) + bias-free conv1x1, fused.  Returns (N, Cout, 1)."""
    n, cin, hw = x.shape
    cout = w.shape[0]
    return pl.pallas_call(
        functools.partial(_gap_conv1x1_kernel, inv_hw=1.0 / float(hw)),
        out_shape=jax.ShapeDtypeStruct((n, cout, 1), x.dtype),
        grid=(n,),
        in_specs=[
            pl.BlockSpec((1, cin, hw), lambda i: (i, 0, 0)),
            pl.BlockSpec((cout, cin), lambda i: (0, 0)),
        ],
        out_specs=pl.BlockSpec((1, cout, 1), lambda i: (i, 0, 0)),
        compiler_params=_cparams("parallel"),
    )(x, w)


# ----------------------------- JAX glue ops -------------------------------

def avg_pool_nchw(x, k, s):
    # TODO(synk): windowed AvgPool2d (count_include_pad=True, tiny outputs) stays in
    # JAX glue (lax.reduce_window) rather than a dedicated Pallas kernel.
    p = (k - 1) // 2
    summed = lax.reduce_window(x, 0.0, lax.add, (1, 1, k, k), (1, 1, s, s),
                               ((0, 0), (0, 0), (p, p), (p, p)))
    return summed / float(k * k)


def bilinear_upsample_align_corners(x, out_h, out_w):
    # TODO(synk): gather-based bilinear (align_corners=True) upsample of the tiny pooled
    # maps stays in JAX glue; no clean Pallas equivalent.
    n, c, hin, win = x.shape
    if hin == 1 and win == 1:
        return jnp.broadcast_to(x, (n, c, out_h, out_w))

    def src(out_size, in_size):
        if out_size == 1:
            return jnp.zeros((1,), jnp.float32)
        return jnp.arange(out_size, dtype=jnp.float32) * ((in_size - 1) / (out_size - 1))

    ys, xs = src(out_h, hin), src(out_w, win)
    y0 = jnp.clip(jnp.floor(ys).astype(jnp.int32), 0, hin - 1)
    y1 = jnp.clip(y0 + 1, 0, hin - 1)
    wy = (ys - y0.astype(jnp.float32))[None, None, :, None]
    x0 = jnp.clip(jnp.floor(xs).astype(jnp.int32), 0, win - 1)
    x1 = jnp.clip(x0 + 1, 0, win - 1)
    wx = (xs - x0.astype(jnp.float32))[None, None, None, :]
    rows = x[:, :, y0, :] * (1.0 - wy) + x[:, :, y1, :] * wy        # (n, c, out_h, win)
    out = rows[:, :, :, x0] * (1.0 - wx) + rows[:, :, :, x1] * wx   # (n, c, out_h, out_w)
    return out


# ----------------------------- parameters -------------------------------

def _fold_bn(key, cout):
    k1, k2, k3, k4 = jax.random.split(key, 4)
    gamma = 1.0 + 0.1 * jax.random.normal(k1, (cout,), jnp.float32)
    beta = 0.1 * jax.random.normal(k2, (cout,), jnp.float32)
    mean = 0.1 * jax.random.normal(k3, (cout,), jnp.float32)
    var = 0.5 + jnp.abs(jax.random.normal(k4, (cout,), jnp.float32))
    scale = gamma / jnp.sqrt(var + 1e-5)
    bias = beta - mean * scale
    return scale, bias


def init_dappm_params(key, in_channels, out_channels):
    hid = in_channels // 4
    keys = iter(jax.random.split(key, 32))

    def convbnact_1x1(cin, cout):
        w = 0.1 * jax.random.normal(next(keys), (cout, cin), jnp.float32)
        scale, bias = _fold_bn(next(keys), cout)
        return {"w": w, "scale": scale, "bias": bias}

    def convbnact_3x3(cin, cout):
        # conceptual torch layout (cout, cin, 3, 3) -> im2col layout (cout, 9*cin),
        # tap-major / channel-minor, matching the kernel's patch buffer.
        w = 0.1 * jax.random.normal(next(keys), (cout, cin, 3, 3), jnp.float32)
        w_flat = jnp.transpose(w, (0, 2, 3, 1)).reshape(cout, 9 * cin)
        scale, bias = _fold_bn(next(keys), cout)
        return {"w": w_flat, "scale": scale, "bias": bias}

    def conv1x1_plain(cin, cout):
        # bias-free 1x1 conv (the `conv1x1` helper in the reference)
        return 0.1 * jax.random.normal(next(keys), (cout, cin), jnp.float32)

    # conv_last weight (cout, 5*hid) split into 5 per-branch slabs so the kernel can
    # consume y1..y5 directly without materializing the channel concat.
    w_last = 0.1 * jax.random.normal(next(keys), (out_channels, 5 * hid), jnp.float32)
    w_last5 = jnp.transpose(w_last.reshape(out_channels, 5, hid), (1, 0, 2))
    scale_l, bias_l = _fold_bn(next(keys), out_channels)

    return {
        "conv0": convbnact_1x1(in_channels, out_channels),
        "conv1": convbnact_1x1(in_channels, hid),
        "pool2_w": conv1x1_plain(in_channels, hid),
        "conv2": convbnact_3x3(hid, hid),
        "pool3_w": conv1x1_plain(in_channels, hid),
        "conv3": convbnact_3x3(hid, hid),
        "pool4_w": conv1x1_plain(in_channels, hid),
        "conv4": convbnact_3x3(hid, hid),
        "pool5_w": conv1x1_plain(in_channels, hid),
        "conv5": convbnact_3x3(hid, hid),
        "conv_last": {"w": w_last5, "scale": scale_l, "bias": bias_l},
    }


# ----------------------------- DAPPM forward -------------------------------

@jax.jit
def dappm_forward(x_nchw, p):
    n, cin, h, w = x_nchw.shape
    hw = h * w
    x = x_nchw.reshape(n, cin, hw)       # channels-first, spatial flattened on lanes

    y0 = conv1x1_fused(x, p["conv0"]["w"], p["conv0"]["scale"], p["conv0"]["bias"], True)
    y1 = conv1x1_fused(x, p["conv1"]["w"], p["conv1"]["scale"], p["conv1"]["bias"], True)
    hid = y1.shape[1]
    one = jnp.ones((hid,), jnp.float32)
    zero = jnp.zeros((hid,), jnp.float32)

    def pooled_branch(k, s, w1x1):
        pooled = avg_pool_nchw(x_nchw, k, s)
        ph, pw = pooled.shape[2], pooled.shape[3]
        pooled = conv1x1_fused(pooled.reshape(n, cin, ph * pw), w1x1, one, zero, False)
        up = bilinear_upsample_align_corners(pooled.reshape(n, hid, ph, pw), h, w)
        return up.reshape(n, hid, hw)

    y2 = add_conv3x3_fused(y1, pooled_branch(5, 2, p["pool2_w"]),
                           p["conv2"]["w"], p["conv2"]["scale"], p["conv2"]["bias"], h, w)
    y3 = add_conv3x3_fused(y2, pooled_branch(9, 4, p["pool3_w"]),
                           p["conv3"]["w"], p["conv3"]["scale"], p["conv3"]["bias"], h, w)
    y4 = add_conv3x3_fused(y3, pooled_branch(17, 8, p["pool4_w"]),
                           p["conv4"]["w"], p["conv4"]["scale"], p["conv4"]["bias"], h, w)
    # pool5: global avg pool + 1x1; align_corners upsample from 1x1 == broadcast,
    # which happens inside the conv5 kernel via the (hid, 1) broadcast add.
    y5g = gap_conv1x1(x, p["pool5_w"])                              # (n, hid, 1)
    y5 = add_conv3x3_fused(y4, y5g,
                           p["conv5"]["w"], p["conv5"]["scale"], p["conv5"]["bias"], h, w)

    out = concat_conv1x1_fused([y1, y2, y3, y4, y5], p["conv_last"]["w"],
                               p["conv_last"]["scale"], p["conv_last"]["bias"], y0)
    return out.reshape(n, -1, h, w)      # already NCHW


if __name__ == "__main__":
    N, C, H, W = 2, 16, 16, 16                    # in_channels=16 -> hid=4
    OUT_C = 16
    key = jax.random.PRNGKey(0)
    kx, kp = jax.random.split(key)
    x = jax.random.normal(kx, (N, C, H, W), jnp.float32)   # NCHW, like the PyTorch module
    params = init_dappm_params(kp, in_channels=C, out_channels=OUT_C)

    out = dappm_forward(x, params)
    jax.block_until_ready(out)
    assert out.shape == (N, OUT_C, H, W), out.shape
    assert jnp.all(jnp.isfinite(out))
    print("KERNEL_OK")
</pallas_src>

<mosaic_0001>
module attributes {stable_mosaic.version = 11 : i64} {
  func.func @_conv1x1_kernel(%arg0: i32, %arg1: i32, %arg2: memref<1x16x64xf32, #tpu.memory_space<vmem>>, %arg3: memref<4x16xf32, #tpu.memory_space<vmem>>, %arg4: memref<4x1xf32, #tpu.memory_space<vmem>>, %arg5: memref<4x1xf32, #tpu.memory_space<vmem>>, %arg6: memref<1x4x64xf32, #tpu.memory_space<vmem>>) attributes {dimension_semantics = [#tpu.dimension_semantics<parallel>, #tpu.dimension_semantics<parallel>], iteration_bounds = array<i64: 2, 1>, scalar_prefetch = 0 : i64, scratch_operands = 0 : i64, tpu.core_type = #tpu.core_type<tc>, window_params = [{transform_indices = @transform_0, window_bounds = array<i64: 1, 16, 64>}, {pipeline_mode = #tpu.pipeline_mode<synchronous>, transform_indices = @transform_1, window_bounds = array<i64: 4, 16>}, {pipeline_mode = #tpu.pipeline_mode<synchronous>, transform_indices = @transform_2, window_bounds = array<i64: 4, 1>}, {pipeline_mode = #tpu.pipeline_mode<synchronous>, transform_indices = @transform_3, window_bounds = array<i64: 4, 1>}, {transform_indices = @transform_4, window_bounds = array<i64: 1, 4, 64>}]} {
    %c0 = arith.constant 0 : index
    %c0_0 = arith.constant 0 : index
    %0 = vector.load %arg3[%c0, %c0_0] : memref<4x16xf32, #tpu.memory_space<vmem>>, vector<4x16xf32>
    %c0_1 = arith.constant 0 : index
    %c0_2 = arith.constant 0 : index
    %c0_3 = arith.constant 0 : index
    %1 = vector.load %arg2[%c0_1, %c0_2, %c0_3] : memref<1x16x64xf32, #tpu.memory_space<vmem>>, vector<1x16x64xf32>
    %2 = vector.shape_cast %1 : vector<1x16x64xf32> to vector<16x64xf32>
    %cst = arith.constant dense<0.000000e+00> : vector<4x64xf32>
    %3 = tpu.matmul %0, %2, %cst {dimension_numbers = #tpu.dot_dimension_numbers<[1], [0], [0], [1], [0, 0, 1, 1], [], []>} : vector<4x16xf32>, vector<16x64xf32>, vector<4x64xf32> -> vector<4x64xf32>
    %c0_4 = arith.constant 0 : index
    %c0_5 = arith.constant 0 : index
    %4 = vector.load %arg4[%c0_4, %c0_5] : memref<4x1xf32, #tpu.memory_space<vmem>>, vector<4x1xf32>
    %5 = vector.broadcast %4 : vector<4x1xf32> to vector<4x64xf32>
    %6 = arith.mulf %3, %5 : vector<4x64xf32>
    %c0_6 = arith.constant 0 : index
    %c0_7 = arith.constant 0 : index
    %7 = vector.load %arg5[%c0_6, %c0_7] : memref<4x1xf32, #tpu.memory_space<vmem>>, vector<4x1xf32>
    %8 = vector.broadcast %7 : vector<4x1xf32> to vector<4x64xf32>
    %9 = arith.addf %6, %8 : vector<4x64xf32>
    %c0_8 = arith.constant 0 : index
    %c0_9 = arith.constant 0 : index
    %c0_10 = arith.constant 0 : index
    %10 = vector.load %arg6[%c0_8, %c0_9, %c0_10] : memref<1x4x64xf32, #tpu.memory_space<vmem>>, vector<1x4x64xf32>
    %11 = vector.shape_cast %10 : vector<1x4x64xf32> to vector<4x64xf32>
    %12 = vector.shape_cast %9 : vector<4x64xf32> to vector<1x4x64xf32>
    tpu.vector_store %arg6[%c0_8, %c0_9, %c0_10], %12 {strides = array<i32>} : memref<1x4x64xf32, #tpu.memory_space<vmem>>, vector<1x4x64xf32>,
    return
  }
  func.func @transform_0(%arg0: i32, %arg1: i32) -> (i32, i32, i32) {
    %c0_i32 = arith.constant 0 : i32
    %c0_i32_0 = arith.constant 0 : i32
    return %arg0, %c0_i32, %arg1 : i32, i32, i32
  }
  func.func @transform_1(%arg0: i32, %arg1: i32) -> (i32, i32) {
    %c0_i32 = arith.constant 0 : i32
    %c0_i32_0 = arith.constant 0 : i32
    %c0_i32_1 = arith.constant 0 : i32
    return %c0_i32, %c0_i32_0 : i32, i32
  }
  func.func @transform_2(%arg0: i32, %arg1: i32) -> (i32, i32) {
    %c0_i32 = arith.constant 0 : i32
    %c0_i32_0 = arith.constant 0 : i32
    %c0_i32_1 = arith.constant 0 : i32
    return %c0_i32, %c0_i32_0 : i32, i32
  }
  func.func @transform_3(%arg0: i32, %arg1: i32) -> (i32, i32) {
    %c0_i32 = arith.constant 0 : i32
    %c0_i32_0 = arith.constant 0 : i32
    %c0_i32_1 = arith.constant 0 : i32
    return %c0_i32, %c0_i32_0 : i32, i32
  }
  func.func @transform_4(%arg0: i32, %arg1: i32) -> (i32, i32, i32) {
    %c0_i32 = arith.constant 0 : i32
    %c0_i32_0 = arith.constant 0 : i32
    return %arg0, %c0_i32, %arg1 : i32, i32, i32
  }
}

module attributes {stable_mosaic.version = 11 : i64} {
  func.func @_conv1x1_kernel(%arg0: i32, %arg1: i32, %arg2: memref<1x16x256xf32, #tpu.memory_space<vmem>>, %arg3: memref<4x16xf32, #tpu.memory_space<vmem>>, %arg4: memref<4x1xf32, #tpu.memory_space<vmem>>, %arg5: memref<4x1xf32, #tpu.memory_space<vmem>>, %arg6: memref<1x4x256xf32, #tpu.memory_space<vmem>>) attributes {dimension_semantics = [#tpu.dimension_semantics<parallel>, #tpu.dimension_semantics<parallel>], iteration_bounds = array<i64: 2, 1>, scalar_prefetch = 0 : i64, scratch_operands = 0 : i64, tpu.core_type = #tpu.core_type<tc>, window_params = [{transform_indices = @transform_0, window_bounds = array<i64: 1, 16, 256>}, {pipeline_mode = #tpu.pipeline_mode<synchronous>, transform_indices = @transform_1, window_bounds = array<i64: 4, 16>}, {pipeline_mode = #tpu.pipeline_mode<synchronous>, transform_indices = @transform_2, window_bounds = array<i64: 4, 1>}, {pipeline_mode = #tpu.pipeline_mode<synchronous>, transform_indices = @transform_3, window_bounds = array<i64: 4, 1>}, {transform_indices = @transform_4, window_bounds = array<i64: 1, 4, 256>}]} {
    %c0 = arith.constant 0 : index
    %c0_0 = arith.constant 0 : index
    %0 = vector.load %arg3[%c0, %c0_0] : memref<4x16xf32, #tpu.memory_space<vmem>>, vector<4x16xf32>
    %c0_1 = arith.constant 0 : index
    %c0_2 = arith.constant 0 : index
    %c0_3 = arith.constant 0 : index
    %1 = vector.load %arg2[%c0_1, %c0_2, %c0_3] : memref<1x16x256xf32, #tpu.memory_space<vmem>>, vector<1x16x256xf32>
    %2 = vector.shape_cast %1 : vector<1x16x256xf32> to vector<16x256xf32>
    %cst = arith.constant dense<0.000000e+00> : vector<4x256xf32>
    %3 = tpu.matmul %0, %2, %cst {dimension_numbers = #tpu.dot_dimension_numbers<[1], [0], [0], [1], [0, 0, 1, 1], [], []>} : vector<4x16xf32>, vector<16x256xf32>, vector<4x256xf32> -> vector<4x256xf32>
    %c0_4 = arith.constant 0 : index
    %c0_5 = arith.constant 0 : index
    %4 = vector.load %arg4[%c0_4, %c0_5] : memref<4x1xf32, #tpu.memory_space<vmem>>, vector<4x1xf32>
    %5 = vector.broadcast %4 : vector<4x1xf32> to vector<4x256xf32>
    %6 = arith.mulf %3, %5 : vector<4x256xf32>
    %c0_6 = arith.constant 0 : index
    %c0_7 = arith.constant 0 : index
    %7 = vector.load %arg5[%c0_6, %c0_7] : memref<4x1xf32, #tpu.memory_space<vmem>>, vector<4x1xf32>
    %8 = vector.broadcast %7 : vector<4x1xf32> to vector<4x256xf32>
    %9 = arith.addf %6, %8 : vector<4x256xf32>
    %cst_8 = arith.constant 0.000000e+00 : f32
    %10 = vector.broadcast %cst_8 : f32 to vector<4x256xf32>
    %11 = arith.maximumf %9, %10 : vector<4x256xf32>
    %c0_9 = arith.constant 0 : index
    %c0_10 = arith.constant 0 : index
    %c0_11 = arith.constant 0 : index
    %12 = vector.load %arg6[%c0_9, %c0_10, %c0_11] : memref<1x4x256xf32, #tpu.memory_space<vmem>>, vector<1x4x256xf32>
    %13 = vector.shape_cast %12 : vector<1x4x256xf32> to vector<4x256xf32>
    %14 = vector.shape_cast %11 : vector<4x256xf32> to vector<1x4x256xf32>
    tpu.vector_store %arg6[%c0_9, %c0_10, %c0_11], %14 {strides = array<i32>} : memref<1x4x256xf32, #tpu.memory_space<vmem>>, vector<1x4x256xf32>,
    return
  }
  func.func @transform_0(%arg0: i32, %arg1: i32) -> (i32, i32, i32) {
    %c0_i32 = arith.constant 0 : i32
    %c0_i32_0 = arith.constant 0 : i32
    return %arg0, %c0_i32, %arg1 : i32, i32, i32
  }
  func.func @transform_1(%arg0: i32, %arg1: i32) -> (i32, i32) {
    %c0_i32 = arith.constant 0 : i32
    %c0_i32_0 = arith.constant 0 : i32
    %c0_i32_1 = arith.constant 0 : i32
    return %c0_i32, %c0_i32_0 : i32, i32
  }
  func.func @transform_2(%arg0: i32, %arg1: i32) -> (i32, i32) {
    %c0_i32 = arith.constant 0 : i32
    %c0_i32_0 = arith.constant 0 : i32
    %c0_i32_1 = arith.constant 0 : i32
    return %c0_i32, %c0_i32_0 : i32, i32
  }
  func.func @transform_3(%arg0: i32, %arg1: i32) -> (i32, i32) {
    %c0_i32 = arith.constant 0 : i32
    %c0_i32_0 = arith.constant 0 : i32
    %c0_i32_1 = arith.constant 0 : i32
    return %c0_i32, %c0_i32_0 : i32, i32
  }
  func.func @transform_4(%arg0: i32, %arg1: i32) -> (i32, i32, i32) {
    %c0_i32 = arith.constant 0 : i32
    %c0_i32_0 = arith.constant 0 : i32
    return %arg0, %c0_i32, %arg1 : i32, i32, i32
  }
}

module attributes {stable_mosaic.version = 11 : i64} {
  func.func @_add_conv3x3_kernel(%arg0: i32, %arg1: memref<1x4x256xf32, #tpu.memory_space<vmem>>, %arg2: memref<1x4x256xf32, #tpu.memory_space<vmem>>, %arg3: memref<4x36xf32, #tpu.memory_space<vmem>>, %arg4: memref<4x1xf32, #tpu.memory_space<vmem>>, %arg5: memref<4x1xf32, #tpu.memory_space<vmem>>, %arg6: memref<1x4x256xf32, #tpu.memory_space<vmem>>, %arg7: memref<4x290xf32, #tpu.memory_space<vmem>>, %arg8: memref<36x256xf32, #tpu.memory_space<vmem>>) attributes {dimension_semantics = [#tpu.dimension_semantics<parallel>], iteration_bounds = array<i64: 2>, scalar_prefetch = 0 : i64, scratch_operands = 2 : i64, tpu.core_type = #tpu.core_type<tc>, window_params = [{transform_indices = @transform_0, window_bounds = array<i64: 1, 4, 256>}, {transform_indices = @transform_1, window_bounds = array<i64: 1, 4, 256>}, {pipeline_mode = #tpu.pipeline_mode<synchronous>, transform_indices = @transform_2, window_bounds = array<i64: 4, 36>}, {pipeline_mode = #tpu.pipeline_mode<synchronous>, transform_indices = @transform_3, window_bounds = array<i64: 4, 1>}, {pipeline_mode = #tpu.pipeline_mode<synchronous>, transform_indices = @transform_4, window_bounds = array<i64: 4, 1>}, {transform_indices = @transform_5, window_bounds = array<i64: 1, 4, 256>}]} {
    %cst = arith.constant 0.000000e+00 : f32
    %0 = vector.broadcast %cst : f32 to vector<4x290xf32>
    %c0 = arith.constant 0 : index
    %c0_0 = arith.constant 0 : index
    %1 = vector.load %arg7[%c0, %c0_0] : memref<4x290xf32, #tpu.memory_space<vmem>>, vector<4x290xf32>
    tpu.vector_store %arg7[%c0, %c0_0], %0 {strides = array<i32>} : memref<4x290xf32, #tpu.memory_space<vmem>>, vector<4x290xf32>,
    %c0_1 = arith.constant 0 : index
    %c0_2 = arith.constant 0 : index
    %c0_3 = arith.constant 0 : index
    %2 = vector.load %arg1[%c0_1, %c0_2, %c0_3] : memref<1x4x256xf32, #tpu.memory_space<vmem>>, vector<1x4x256xf32>
    %3 = vector.shape_cast %2 : vector<1x4x256xf32> to vector<4x256xf32>
    %c0_4 = arith.constant 0 : index
    %c0_5 = arith.constant 0 : index
    %c0_6 = arith.constant 0 : index
    %4 = vector.load %arg2[%c0_4, %c0_5, %c0_6] : memref<1x4x256xf32, #tpu.memory_space<vmem>>, vector<1x4x256xf32>
    %5 = vector.shape_cast %4 : vector<1x4x256xf32> to vector<4x256xf32>
    %6 = arith.addf %3, %5 : vector<4x256xf32>
    %c0_7 = arith.constant 0 : index
    %c17 = arith.constant 17 : index
    %7 = vector.load %arg7[%c0_7, %c17] : memref<4x290xf32, #tpu.memory_space<vmem>>, vector<4x256xf32>
    tpu.vector_store %arg7[%c0_7, %c17], %6 {strides = array<i32>} : memref<4x290xf32, #tpu.memory_space<vmem>>, vector<4x256xf32>,
    %8 = tpu.iota {dimensions = array<i32: 1>} : vector<1x256xi32>
    %c16_i32 = arith.constant 16 : i32
    %c0_i32 = arith.constant 0 : i32
    %9 = arith.cmpi eq, %c16_i32, %c0_i32 : i32
    %c1_i32 = arith.constant 1 : i32
    %10 = arith.select %9, %c1_i32, %c16_i32 : i32
    %11 = vector.broadcast %10 : i32 to vector<1x256xi32>
    %12 = arith.remsi %8, %11 : vector<1x256xi32>
    %c0_i32_8 = arith.constant 0 : i32
    %13 = vector.broadcast %c0_i32_8 : i32 to vector<1x256xi32>
    %14 = arith.cmpi ne, %12, %13 : vector<1x256xi32>
    %c0_i32_9 = arith.constant 0 : i32
    %15 = vector.broadcast %c0_i32_9 : i32 to vector<1x256xi32>
    %16 = arith.cmpi slt, %12, %15 : vector<1x256xi32>
    %c0_i32_10 = arith.constant 0 : i32
    %17 = arith.cmpi slt, %10, %c0_i32_10 : i32
    %18 = vector.broadcast %17 : i1 to vector<1x256xi1>
    %19 = vector.broadcast %18 : vector<1x256xi1> to vector<1x256xi1>
    %20 = arith.xori %16, %19 : vector<1x256xi1>
    %21 = arith.andi %20, %14 : vector<1x256xi1>
    %22 = vector.broadcast %10 : i32 to vector<1x256xi32>
    %23 = arith.addi %12, %22 : vector<1x256xi32>
    %24 = arith.select %21, %23, %12 : vector<1x256xi1>, vector<1x256xi32>
    %c1_i32_11 = arith.constant 1 : i32
    %25 = vector.broadcast %c1_i32_11 : i32 to vector<1x256xi32>
    %26 = arith.cmpi sge, %24, %25 : vector<1x256xi32>
    %c14_i32 = arith.constant 14 : i32
    %27 = vector.broadcast %c14_i32 : i32 to vector<1x256xi32>
    %28 = arith.cmpi sle, %24, %27 : vector<1x256xi32>
    %c0_12 = arith.constant 0 : index
    %c0_13 = arith.constant 0 : index
    %29 = vector.load %arg7[%c0_12, %c0_13] : memref<4x290xf32, #tpu.memory_space<vmem>>, vector<4x256xf32>
    %cst_14 = arith.constant 0.000000e+00 : f32
    %30 = vector.shape_cast %26 : vector<1x256xi1> to vector<1x256xi1>
    %31 = vector.broadcast %30 : vector<1x256xi1> to vector<4x256xi1>
    %32 = vector.broadcast %cst_14 : f32 to vector<4x256xf32>
    %33 = arith.select %31, %29, %32 : vector<4x256xi1>, vector<4x256xf32>
    %c0_15 = arith.constant 0 : index
    %c0_16 = arith.constant 0 : index
    %34 = vector.load %arg8[%c0_15, %c0_16] : memref<36x256xf32, #tpu.memory_space<vmem>>, vector<4x256xf32>
    tpu.vector_store %arg8[%c0_15, %c0_16], %33 {strides = array<i32>} : memref<36x256xf32, #tpu.memory_space<vmem>>, vector<4x256xf32>,
    %c0_17 = arith.constant 0 : index
    %c1 = arith.constant 1 : index
    %35 = vector.load %arg7[%c0_17, %c1] : memref<4x290xf32, #tpu.memory_space<vmem>>, vector<4x256xf32>
    %c4 = arith.constant 4 : index
    %c0_18 = arith.constant 0 : index
    %36 = vector.load %arg8[%c4, %c0_18] : memref<36x256xf32, #tpu.memory_space<vmem>>, vector<4x256xf32>
    tpu.vector_store %arg8[%c4, %c0_18], %35 {strides = array<i32>} : memref<36x256xf32, #tpu.memory_space<vmem>>, vector<4x256xf32>,
    %c0_19 = arith.constant 0 : index
    %c2 = arith.constant 2 : index
    %37 = vector.load %arg7[%c0_19, %c2] : memref<4x290xf32, #tpu.memory_space<vmem>>, vector<4x256xf32>
    %cst_20 = arith.constant 0.000000e+00 : f32
    %38 = vector.shape_cast %28 : vector<1x256xi1> to vector<1x256xi1>
    %39 = vector.broadcast %38 : vector<1x256xi1> to vector<4x256xi1>
    %40 = vector.broadcast %cst_20 : f32 to vector<4x256xf32>
    %41 = arith.select %39, %37, %40 : vector<4x256xi1>, vector<4x256xf32>
    %c8 = arith.constant 8 : index
    %c0_21 = arith.constant 0 : index
    %42 = vector.load %arg8[%c8, %c0_21] : memref<36x256xf32, #tpu.memory_space<vmem>>, vector<4x256xf32>
    tpu.vector_store %arg8[%c8, %c0_21], %41 {strides = array<i32>} : memref<36x256xf32, #tpu.memory_space<vmem>>, vector<4x256xf32>,
    %c0_22 = arith.constant 0 : index
    %c16 = arith.constant 16 : index
    %43 = vector.load %arg7[%c0_22, %c16] : memref<4x290xf32, #tpu.memory_space<vmem>>, vector<4x256xf32>
    %cst_23 = arith.constant 0.000000e+00 : f32
    %44 = vector.shape_cast %26 : vector<1x256xi1> to vector<1x256xi1>
    %45 = vector.broadcast %44 : vector<1x256xi1> to vector<4x256xi1>
    %46 = vector.broadcast %cst_23 : f32 to vector<4x256xf32>
    %47 = arith.select %45, %43, %46 : vector<4x256xi1>, vector<4x256xf32>
    %c12 = arith.constant 12 : index
    %c0_24 = arith.constant 0 : index
    %48 = vector.load %arg8[%c12, %c0_24] : memref<36x256xf32, #tpu.memory_space<vmem>>, vector<4x256xf32>
    tpu.vector_store %arg8[%c12, %c0_24], %47 {strides = array<i32>} : memref<36x256xf32, #tpu.memory_space<vmem>>, vector<4x256xf32>,
    %c0_25 = arith.constant 0 : index
    %c17_26 = arith.constant 17 : index
    %49 = vector.load %arg7[%c0_25, %c17_26] : memref<4x290xf32, #tpu.memory_space<vmem>>, vector<4x256xf32>
    %c16_27 = arith.constant 16 : index
    %c0_28 = arith.constant 0 : index
    %50 = vector.load %arg8[%c16_27, %c0_28] : memref<36x256xf32, #tpu.memory_space<vmem>>, vector<4x256xf32>
    tpu.vector_store %arg8[%c16_27, %c0_28], %49 {strides = array<i32>} : memref<36x256xf32, #tpu.memory_space<vmem>>, vector<4x256xf32>,
    %c0_29 = arith.constant 0 : index
    %c18 = arith.constant 18 : index
    %51 = vector.load %arg7[%c0_29, %c18] : memref<4x290xf32, #tpu.memory_space<vmem>>, vector<4x256xf32>
    %cst_30 = arith.constant 0.000000e+00 : f32
    %52 = vector.shape_cast %28 : vector<1x256xi1> to vector<1x256xi1>
    %53 = vector.broadcast %52 : vector<1x256xi1> to vector<4x256xi1>
    %54 = vector.broadcast %cst_30 : f32 to vector<4x256xf32>
    %55 = arith.select %53, %51, %54 : vector<4x256xi1>, vector<4x256xf32>
    %c20 = arith.constant 20 : index
    %c0_31 = arith.constant 0 : index
    %56 = vector.load %arg8[%c20, %c0_31] : memref<36x256xf32, #tpu.memory_space<vmem>>, vector<4x256xf32>
    tpu.vector_store %arg8[%c20, %c0_31], %55 {strides = array<i32>} : memref<36x256xf32, #tpu.memory_space<vmem>>, vector<4x256xf32>,
    %c0_32 = arith.constant 0 : index
    %c32 = arith.constant 32 : index
    %57 = vector.load %arg7[%c0_32, %c32] : memref<4x290xf32, #tpu.memory_space<vmem>>, vector<4x256xf32>
    %cst_33 = arith.constant 0.000000e+00 : f32
    %58 = vector.shape_cast %26 : vector<1x256xi1> to vector<1x256xi1>
    %59 = vector.broadcast %58 : vector<1x256xi1> to vector<4x256xi1>
    %60 = vector.broadcast %cst_33 : f32 to vector<4x256xf32>
    %61 = arith.select %59, %57, %60 : vector<4x256xi1>, vector<4x256xf32>
    %c24 = arith.constant 24 : index
    %c0_34 = arith.constant 0 : index
    %62 = vector.load %arg8[%c24, %c0_34] : memref<36x256xf32, #tpu.memory_space<vmem>>, vector<4x256xf32>
    tpu.vector_store %arg8[%c24, %c0_34], %61 {strides = array<i32>} : memref<36x256xf32, #tpu.memory_space<vmem>>, vector<4x256xf32>,
    %c0_35 = arith.constant 0 : index
    %c33 = arith.constant 33 : index
    %63 = vector.load %arg7[%c0_35, %c33] : memref<4x290xf32, #tpu.memory_space<vmem>>, vector<4x256xf32>
    %c28 = arith.constant 28 : index
    %c0_36 = arith.constant 0 : index
    %64 = vector.load %arg8[%c28, %c0_36] : memref<36x256xf32, #tpu.memory_space<vmem>>, vector<4x256xf32>
    tpu.vector_store %arg8[%c28, %c0_36], %63 {strides = array<i32>} : memref<36x256xf32, #tpu.memory_space<vmem>>, vector<4x256xf32>,
    %c0_37 = arith.constant 0 : index
    %c34 = arith.constant 34 : index
    %65 = vector.load %arg7[%c0_37, %c34] : memref<4x290xf32, #tpu.memory_space<vmem>>, vector<4x256xf32>
    %cst_38 = arith.constant 0.000000e+00 : f32
    %66 = vector.shape_cast %28 : vector<1x256xi1> to vector<1x256xi1>
    %67 = vector.broadcast %66 : vector<1x256xi1> to vector<4x256xi1>
    %68 = vector.broadcast %cst_38 : f32 to vector<4x256xf32>
    %69 = arith.select %67, %65, %68 : vector<4x256xi1>, vector<4x256xf32>
    %c32_39 = arith.constant 32 : index
    %c0_40 = arith.constant 0 : index
    %70 = vector.load %arg8[%c32_39, %c0_40] : memref<36x256xf32, #tpu.memory_space<vmem>>, vector<4x256xf32>
    tpu.vector_store %arg8[%c32_39, %c0_40], %69 {strides = array<i32>} : memref<36x256xf32, #tpu.memory_space<vmem>>, vector<4x256xf32>,
    %c0_41 = arith.constant 0 : index
    %c0_42 = arith.constant 0 : index
    %71 = vector.load %arg3[%c0_41, %c0_42] : memref<4x36xf32, #tpu.memory_space<vmem>>, vector<4x36xf32>
    %c0_43 = arith.constant 0 : index
    %c0_44 = arith.constant 0 : index
    %72 = vector.load %arg8[%c0_43, %c0_44] : memref<36x256xf32, #tpu.memory_space<vmem>>, vector<36x256xf32>
    %cst_45 = arith.constant dense<0.000000e+00> : vector<4x256xf32>
    %73 = tpu.matmul %71, %72, %cst_45 {dimension_numbers = #tpu.dot_dimension_numbers<[1], [0], [0], [1], [0, 0, 1, 1], [], []>} : vector<4x36xf32>, vector<36x256xf32>, vector<4x256xf32> -> vector<4x256xf32>
    %c0_46 = arith.constant 0 : index
    %c0_47 = arith.constant 0 : index
    %74 = vector.load %arg4[%c0_46, %c0_47] : memref<4x1xf32, #tpu.memory_space<vmem>>, vector<4x1xf32>
    %75 = vector.broadcast %74 : vector<4x1xf32> to vector<4x256xf32>
    %76 = arith.mulf %73, %75 : vector<4x256xf32>
    %c0_48 = arith.constant 0 : index
    %c0_49 = arith.constant 0 : index
    %77 = vector.load %arg5[%c0_48, %c0_49] : memref<4x1xf32, #tpu.memory_space<vmem>>, vector<4x1xf32>
    %78 = vector.broadcast %77 : vector<4x1xf32> to vector<4x256xf32>
    %79 = arith.addf %76, %78 : vector<4x256xf32>
    %cst_50 = arith.constant 0.000000e+00 : f32
    %80 = vector.broadcast %cst_50 : f32 to vector<4x256xf32>
    %81 = arith.maximumf %79, %80 : vector<4x256xf32>
    %c0_51 = arith.constant 0 : index
    %c0_52 = arith.constant 0 : index
    %c0_53 = arith.constant 0 : index
    %82 = vector.load %arg6[%c0_51, %c0_52, %c0_53] : memref<1x4x256xf32, #tpu.memory_space<vmem>>, vector<1x4x256xf32>
    %83 = vector.shape_cast %82 : vector<1x4x256xf32> to vector<4x256xf32>
    %84 = vector.shape_cast %81 : vector<4x256xf32> to vector<1x4x256xf32>
    tpu.vector_store %arg6[%c0_51, %c0_52, %c0_53], %84 {strides = array<i32>} : memref<1x4x256xf32, #tpu.memory_space<vmem>>, vector<1x4x256xf32>,
    return
  }
  func.func @transform_0(%arg0: i32) -> (i32, i32, i32) {
    %c0_i32 = arith.constant 0 : i32
    %c0_i32_0 = arith.constant 0 : i32
    %c0_i32_1 = arith.constant 0 : i32
    return %arg0, %c0_i32, %c0_i32_0 : i32, i32, i32
  }
  func.func @transform_1(%arg0: i32) -> (i32, i32, i32) {
    %c0_i32 = arith.constant 0 : i32
    %c0_i32_0 = arith.constant 0 : i32
    %c0_i32_1 = arith.constant 0 : i32
    return %arg0, %c0_i32, %c0_i32_0 : i32, i32, i32
  }
  func.func @transform_2(%arg0: i32) -> (i32, i32) {
    %c0_i32 = arith.constant 0 : i32
    %c0_i32_0 = arith.constant 0 : i32
    %c0_i32_1 = arith.constant 0 : i32
    return %c0_i32, %c0_i32_0 : i32, i32
  }
  func.func @transform_3(%arg0: i32) -> (i32, i32) {
    %c0_i32 = arith.constant 0 : i32
    %c0_i32_0 = arith.constant 0 : i32
    %c0_i32_1 = arith.constant 0 : i32
    return %c0_i32, %c0_i32_0 : i32, i32
  }
  func.func @transform_4(%arg0: i32) -> (i32, i32) {
    %c0_i32 = arith.constant 0 : i32
    %c0_i32_0 = arith.constant 0 : i32
    %c0_i32_1 = arith.constant 0 : i32
    return %c0_i32, %c0_i32_0 : i32, i32
  }
  func.func @transform_5(%arg0: i32) -> (i32, i32, i32) {
    %c0_i32 = arith.constant 0 : i32
    %c0_i32_0 = arith.constant 0 : i32
    %c0_i32_1 = arith.constant 0 : i32
    return %arg0, %c0_i32, %c0_i32_0 : i32, i32, i32
  }
}

module attributes {stable_mosaic.version = 11 : i64} {
  func.func @_conv1x1_kernel(%arg0: i32, %arg1: i32, %arg2: memref<1x16x16xf32, #tpu.memory_space<vmem>>, %arg3: memref<4x16xf32, #tpu.memory_space<vmem>>, %arg4: memref<4x1xf32, #tpu.memory_space<vmem>>, %arg5: memref<4x1xf32, #tpu.memory_space<vmem>>, %arg6: memref<1x4x16xf32, #tpu.memory_space<vmem>>) attributes {dimension_semantics = [#tpu.dimension_semantics<parallel>, #tpu.dimension_semantics<parallel>], iteration_bounds = array<i64: 2, 1>, scalar_prefetch = 0 : i64, scratch_operands = 0 : i64, tpu.core_type = #tpu.core_type<tc>, window_params = [{transform_indices = @transform_0, window_bounds = array<i64: 1, 16, 16>}, {pipeline_mode = #tpu.pipeline_mode<synchronous>, transform_indices = @transform_1, window_bounds = array<i64: 4, 16>}, {pipeline_mode = #tpu.pipeline_mode<synchronous>, transform_indices = @transform_2, window_bounds = array<i64: 4, 1>}, {pipeline_mode = #tpu.pipeline_mode<synchronous>, transform_indices = @transform_3, window_bounds = array<i64: 4, 1>}, {transform_indices = @transform_4, window_bounds = array<i64: 1, 4, 16>}]} {
    %c0 = arith.constant 0 : index
    %c0_0 = arith.constant 0 : index
    %0 = vector.load %arg3[%c0, %c0_0] : memref<4x16xf32, #tpu.memory_space<vmem>>, vector<4x16xf32>
    %c0_1 = arith.constant 0 : index
    %c0_2 = arith.constant 0 : index
    %c0_3 = arith.constant 0 : index
    %1 = vector.load %arg2[%c0_1, %c0_2, %c0_3] : memref<1x16x16xf32, #tpu.memory_space<vmem>>, vector<1x16x16xf32>
    %2 = vector.shape_cast %1 : vector<1x16x16xf32> to vector<16x16xf32>
    %cst = arith.constant dense<0.000000e+00> : vector<4x16xf32>
    %3 = tpu.matmul %0, %2, %cst {dimension_numbers = #tpu.dot_dimension_numbers<[1], [0], [0], [1], [0, 0, 1, 1], [], []>} : vector<4x16xf32>, vector<16x16xf32>, vector<4x16xf32> -> vector<4x16xf32>
    %c0_4 = arith.constant 0 : index
    %c0_5 = arith.constant 0 : index
    %4 = vector.load %arg4[%c0_4, %c0_5] : memref<4x1xf32, #tpu.memory_space<vmem>>, vector<4x1xf32>
    %5 = vector.broadcast %4 : vector<4x1xf32> to vector<4x16xf32>
    %6 = arith.mulf %3, %5 : vector<4x16xf32>
    %c0_6 = arith.constant 0 : index
    %c0_7 = arith.constant 0 : index
    %7 = vector.load %arg5[%c0_6, %c0_7] : memref<4x1xf32, #tpu.memory_space<vmem>>, vector<4x1xf32>
    %8 = vector.broadcast %7 : vector<4x1xf32> to vector<4x16xf32>
    %9 = arith.addf %6, %8 : vector<4x16xf32>
    %c0_8 = arith.constant 0 : index
    %c0_9 = arith.constant 0 : index
    %c0_10 = arith.constant 0 : index
    %10 = vector.load %arg6[%c0_8, %c0_9, %c0_10] : memref<1x4x16xf32, #tpu.memory_space<vmem>>, vector<1x4x16xf32>
    %11 = vector.shape_cast %10 : vector<1x4x16xf32> to vector<4x16xf32>
    %12 = vector.shape_cast %9 : vector<4x16xf32> to vector<1x4x16xf32>
    tpu.vector_store %arg6[%c0_8, %c0_9, %c0_10], %12 {strides = array<i32>} : memref<1x4x16xf32, #tpu.memory_space<vmem>>, vector<1x4x16xf32>,
    return
  }
  func.func @transform_0(%arg0: i32, %arg1: i32) -> (i32, i32, i32) {
    %c0_i32 = arith.constant 0 : i32
    %c0_i32_0 = arith.constant 0 : i32
    return %arg0, %c0_i32, %arg1 : i32, i32, i32
  }
  func.func @transform_1(%arg0: i32, %arg1: i32) -> (i32, i32) {
    %c0_i32 = arith.constant 0 : i32
    %c0_i32_0 = arith.constant 0 : i32
    %c0_i32_1 = arith.constant 0 : i32
    return %c0_i32, %c0_i32_0 : i32, i32
  }
  func.func @transform_2(%arg0: i32, %arg1: i32) -> (i32, i32) {
    %c0_i32 = arith.constant 0 : i32
    %c0_i32_0 = arith.constant 0 : i32
    %c0_i32_1 = arith.constant 0 : i32
    return %c0_i32, %c0_i32_0 : i32, i32
  }
  func.func @transform_3(%arg0: i32, %arg1: i32) -> (i32, i32) {
    %c0_i32 = arith.constant 0 : i32
    %c0_i32_0 = arith.constant 0 : i32
    %c0_i32_1 = arith.constant 0 : i32
    return %c0_i32, %c0_i32_0 : i32, i32
  }
  func.func @transform_4(%arg0: i32, %arg1: i32) -> (i32, i32, i32) {
    %c0_i32 = arith.constant 0 : i32
    %c0_i32_0 = arith.constant 0 : i32
    return %arg0, %c0_i32, %arg1 : i32, i32, i32
  }
}

module attributes {stable_mosaic.version = 11 : i64} {
  func.func @_conv1x1_kernel(%arg0: i32, %arg1: i32, %arg2: memref<1x16x4xf32, #tpu.memory_space<vmem>>, %arg3: memref<4x16xf32, #tpu.memory_space<vmem>>, %arg4: memref<4x1xf32, #tpu.memory_space<vmem>>, %arg5: memref<4x1xf32, #tpu.memory_space<vmem>>, %arg6: memref<1x4x4xf32, #tpu.memory_space<vmem>>) attributes {dimension_semantics = [#tpu.dimension_semantics<parallel>, #tpu.dimension_semantics<parallel>], iteration_bounds = array<i64: 2, 1>, scalar_prefetch = 0 : i64, scratch_operands = 0 : i64, tpu.core_type = #tpu.core_type<tc>, window_params = [{transform_indices = @transform_0, window_bounds = array<i64: 1, 16, 4>}, {pipeline_mode = #tpu.pipeline_mode<synchronous>, transform_indices = @transform_1, window_bounds = array<i64: 4, 16>}, {pipeline_mode = #tpu.pipeline_mode<synchronous>, transform_indices = @transform_2, window_bounds = array<i64: 4, 1>}, {pipeline_mode = #tpu.pipeline_mode<synchronous>, transform_indices = @transform_3, window_bounds = array<i64: 4, 1>}, {transform_indices = @transform_4, window_bounds = array<i64: 1, 4, 4>}]} {
    %c0 = arith.constant 0 : index
    %c0_0 = arith.constant 0 : index
    %0 = vector.load %arg3[%c0, %c0_0] : memref<4x16xf32, #tpu.memory_space<vmem>>, vector<4x16xf32>
    %c0_1 = arith.constant 0 : index
    %c0_2 = arith.constant 0 : index
    %c0_3 = arith.constant 0 : index
    %1 = vector.load %arg2[%c0_1, %c0_2, %c0_3] : memref<1x16x4xf32, #tpu.memory_space<vmem>>, vector<1x16x4xf32>
    %2 = vector.shape_cast %1 : vector<1x16x4xf32> to vector<16x4xf32>
    %cst = arith.constant dense<0.000000e+00> : vector<4x4xf32>
    %3 = tpu.matmul %0, %2, %cst {dimension_numbers = #tpu.dot_dimension_numbers<[1], [0], [0], [1], [0, 0, 1, 1], [], []>} : vector<4x16xf32>, vector<16x4xf32>, vector<4x4xf32> -> vector<4x4xf32>
    %c0_4 = arith.constant 0 : index
    %c0_5 = arith.constant 0 : index
    %4 = vector.load %arg4[%c0_4, %c0_5] : memref<4x1xf32, #tpu.memory_space<vmem>>, vector<4x1xf32>
    %5 = vector.broadcast %4 : vector<4x1xf32> to vector<4x4xf32>
    %6 = arith.mulf %3, %5 : vector<4x4xf32>
    %c0_6 = arith.constant 0 : index
    %c0_7 = arith.constant 0 : index
    %7 = vector.load %arg5[%c0_6, %c0_7] : memref<4x1xf32, #tpu.memory_space<vmem>>, vector<4x1xf32>
    %8 = vector.broadcast %7 : vector<4x1xf32> to vector<4x4xf32>
    %9 = arith.addf %6, %8 : vector<4x4xf32>
    %c0_8 = arith.constant 0 : index
    %c0_9 = arith.constant 0 : index
    %c0_10 = arith.constant 0 : index
    %10 = vector.load %arg6[%c0_8, %c0_9, %c0_10] : memref<1x4x4xf32, #tpu.memory_space<vmem>>, vector<1x4x4xf32>
    %11 = vector.shape_cast %10 : vector<1x4x4xf32> to vector<4x4xf32>
    %12 = vector.shape_cast %9 : vector<4x4xf32> to vector<1x4x4xf32>
    tpu.vector_store %arg6[%c0_8, %c0_9, %c0_10], %12 {strides = array<i32>} : memref<1x4x4xf32, #tpu.memory_space<vmem>>, vector<1x4x4xf32>,
    return
  }
  func.func @transform_0(%arg0: i32, %arg1: i32) -> (i32, i32, i32) {
    %c0_i32 = arith.constant 0 : i32
    %c0_i32_0 = arith.constant 0 : i32
    return %arg0, %c0_i32, %arg1 : i32, i32, i32
  }
  func.func @transform_1(%arg0: i32, %arg1: i32) -> (i32, i32) {
    %c0_i32 = arith.constant 0 : i32
    %c0_i32_0 = arith.constant 0 : i32
    %c0_i32_1 = arith.constant 0 : i32
    return %c0_i32, %c0_i32_0 : i32, i32
  }
  func.func @transform_2(%arg0: i32, %arg1: i32) -> (i32, i32) {
    %c0_i32 = arith.constant 0 : i32
    %c0_i32_0 = arith.constant 0 : i32
    %c0_i32_1 = arith.constant 0 : i32
    return %c0_i32, %c0_i32_0 : i32, i32
  }
  func.func @transform_3(%arg0: i32, %arg1: i32) -> (i32, i32) {
    %c0_i32 = arith.constant 0 : i32
    %c0_i32_0 = arith.constant 0 : i32
    %c0_i32_1 = arith.constant 0 : i32
    return %c0_i32, %c0_i32_0 : i32, i32
  }
  func.func @transform_4(%arg0: i32, %arg1: i32) -> (i32, i32, i32) {
    %c0_i32 = arith.constant 0 : i32
    %c0_i32_0 = arith.constant 0 : i32
    return %arg0, %c0_i32, %arg1 : i32, i32, i32
  }
}

module attributes {stable_mosaic.version = 11 : i64} {
  func.func @_gap_conv1x1_kernel(%arg0: i32, %arg1: memref<1x16x256xf32, #tpu.memory_space<vmem>>, %arg2: memref<4x16xf32, #tpu.memory_space<vmem>>, %arg3: memref<1x4x1xf32, #tpu.memory_space<vmem>>) attributes {dimension_semantics = [#tpu.dimension_semantics<parallel>], iteration_bounds = array<i64: 2>, scalar_prefetch = 0 : i64, scratch_operands = 0 : i64, tpu.core_type = #tpu.core_type<tc>, window_params = [{transform_indices = @transform_0, window_bounds = array<i64: 1, 16, 256>}, {pipeline_mode = #tpu.pipeline_mode<synchronous>, transform_indices = @transform_1, window_bounds = array<i64: 4, 16>}, {transform_indices = @transform_2, window_bounds = array<i64: 1, 4, 1>}]} {
    %c0 = arith.constant 0 : index
    %c0_0 = arith.constant 0 : index
    %c0_1 = arith.constant 0 : index
    %0 = vector.load %arg1[%c0, %c0_0, %c0_1] : memref<1x16x256xf32, #tpu.memory_space<vmem>>, vector<1x16x256xf32>
    %1 = vector.shape_cast %0 : vector<1x16x256xf32> to vector<16x256xf32>
    %cst = arith.constant dense<0.000000e+00> : vector<16xf32>
    %2 = vector.multi_reduction <add>, %1, %cst [1] : vector<16x256xf32> to vector<16xf32>
    %3 = vector.shape_cast %2 : vector<16xf32> to vector<16x1xf32>
    %cst_2 = arith.constant 3.906250e-03 : f32
    %4 = vector.broadcast %cst_2 : f32 to vector<16x1xf32>
    %5 = arith.mulf %3, %4 : vector<16x1xf32>
    %c0_3 = arith.constant 0 : index
    %c0_4 = arith.constant 0 : index
    %6 = vector.load %arg2[%c0_3, %c0_4] : memref<4x16xf32, #tpu.memory_space<vmem>>, vector<4x16xf32>
    %cst_5 = arith.constant dense<0.000000e+00> : vector<4x1xf32>
    %7 = tpu.matmul %6, %5, %cst_5 {dimension_numbers = #tpu.dot_dimension_numbers<[1], [0], [0], [1], [0, 0, 1, 1], [], []>} : vector<4x16xf32>, vector<16x1xf32>, vector<4x1xf32> -> vector<4x1xf32>
    %c0_6 = arith.constant 0 : index
    %c0_7 = arith.constant 0 : index
    %c0_8 = arith.constant 0 : index
    %8 = vector.load %arg3[%c0_6, %c0_7, %c0_8] : memref<1x4x1xf32, #tpu.memory_space<vmem>>, vector<1x4x1xf32>
    %9 = vector.shape_cast %8 : vector<1x4x1xf32> to vector<4x1xf32>
    %10 = vector.shape_cast %7 : vector<4x1xf32> to vector<1x4x1xf32>
    tpu.vector_store %arg3[%c0_6, %c0_7, %c0_8], %10 {strides = array<i32>} : memref<1x4x1xf32, #tpu.memory_space<vmem>>, vector<1x4x1xf32>,
    return
  }
  func.func @transform_0(%arg0: i32) -> (i32, i32, i32) {
    %c0_i32 = arith.constant 0 : i32
    %c0_i32_0 = arith.constant 0 : i32
    %c0_i32_1 = arith.constant 0 : i32
    return %arg0, %c0_i32, %c0_i32_0 : i32, i32, i32
  }
  func.func @transform_1(%arg0: i32) -> (i32, i32) {
    %c0_i32 = arith.constant 0 : i32
    %c0_i32_0 = arith.constant 0 : i32
    %c0_i32_1 = arith.constant 0 : i32
    return %c0_i32, %c0_i32_0 : i32, i32
  }
  func.func @transform_2(%arg0: i32) -> (i32, i32, i32) {
    %c0_i32 = arith.constant 0 : i32
    %c0_i32_0 = arith.constant 0 : i32
    %c0_i32_1 = arith.constant 0 : i32
    return %arg0, %c0_i32, %c0_i32_0 : i32, i32, i32
  }
}

module attributes {stable_mosaic.version = 11 : i64} {
  func.func @_add_conv3x3_kernel(%arg0: i32, %arg1: memref<1x4x256xf32, #tpu.memory_space<vmem>>, %arg2: memref<1x4x1xf32, #tpu.memory_space<vmem>>, %arg3: memref<4x36xf32, #tpu.memory_space<vmem>>, %arg4: memref<4x1xf32, #tpu.memory_space<vmem>>, %arg5: memref<4x1xf32, #tpu.memory_space<vmem>>, %arg6: memref<1x4x256xf32, #tpu.memory_space<vmem>>, %arg7: memref<4x290xf32, #tpu.memory_space<vmem>>, %arg8: memref<36x256xf32, #tpu.memory_space<vmem>>) attributes {dimension_semantics = [#tpu.dimension_semantics<parallel>], iteration_bounds = array<i64: 2>, scalar_prefetch = 0 : i64, scratch_operands = 2 : i64, tpu.core_type = #tpu.core_type<tc>, window_params = [{transform_indices = @transform_0, window_bounds = array<i64: 1, 4, 256>}, {transform_indices = @transform_1, window_bounds = array<i64: 1, 4, 1>}, {pipeline_mode = #tpu.pipeline_mode<synchronous>, transform_indices = @transform_2, window_bounds = array<i64: 4, 36>}, {pipeline_mode = #tpu.pipeline_mode<synchronous>, transform_indices = @transform_3, window_bounds = array<i64: 4, 1>}, {pipeline_mode = #tpu.pipeline_mode<synchronous>, transform_indices = @transform_4, window_bounds = array<i64: 4, 1>}, {transform_indices = @transform_5, window_bounds = array<i64: 1, 4, 256>}]} {
    %cst = arith.constant 0.000000e+00 : f32
    %0 = vector.broadcast %cst : f32 to vector<4x290xf32>
    %c0 = arith.constant 0 : index
    %c0_0 = arith.constant 0 : index
    %1 = vector.load %arg7[%c0, %c0_0] : memref<4x290xf32, #tpu.memory_space<vmem>>, vector<4x290xf32>
    tpu.vector_store %arg7[%c0, %c0_0], %0 {strides = array<i32>} : memref<4x290xf32, #tpu.memory_space<vmem>>, vector<4x290xf32>,
    %c0_1 = arith.constant 0 : index
    %c0_2 = arith.constant 0 : index
    %c0_3 = arith.constant 0 : index
    %2 = vector.load %arg1[%c0_1, %c0_2, %c0_3] : memref<1x4x256xf32, #tpu.memory_space<vmem>>, vector<1x4x256xf32>
    %3 = vector.shape_cast %2 : vector<1x4x256xf32> to vector<4x256xf32>
    %c0_4 = arith.constant 0 : index
    %c0_5 = arith.constant 0 : index
    %c0_6 = arith.constant 0 : index
    %4 = vector.load %arg2[%c0_4, %c0_5, %c0_6] : memref<1x4x1xf32, #tpu.memory_space<vmem>>, vector<1x4x1xf32>
    %5 = vector.shape_cast %4 : vector<1x4x1xf32> to vector<4x1xf32>
    %6 = vector.broadcast %5 : vector<4x1xf32> to vector<4x256xf32>
    %7 = arith.addf %3, %6 : vector<4x256xf32>
    %c0_7 = arith.constant 0 : index
    %c17 = arith.constant 17 : index
    %8 = vector.load %arg7[%c0_7, %c17] : memref<4x290xf32, #tpu.memory_space<vmem>>, vector<4x256xf32>
    tpu.vector_store %arg7[%c0_7, %c17], %7 {strides = array<i32>} : memref<4x290xf32, #tpu.memory_space<vmem>>, vector<4x256xf32>,
    %9 = tpu.iota {dimensions = array<i32: 1>} : vector<1x256xi32>
    %c16_i32 = arith.constant 16 : i32
    %c0_i32 = arith.constant 0 : i32
    %10 = arith.cmpi eq, %c16_i32, %c0_i32 : i32
    %c1_i32 = arith.constant 1 : i32
    %11 = arith.select %10, %c1_i32, %c16_i32 : i32
    %12 = vector.broadcast %11 : i32 to vector<1x256xi32>
    %13 = arith.remsi %9, %12 : vector<1x256xi32>
    %c0_i32_8 = arith.constant 0 : i32
    %14 = vector.broadcast %c0_i32_8 : i32 to vector<1x256xi32>
    %15 = arith.cmpi ne, %13, %14 : vector<1x256xi32>
    %c0_i32_9 = arith.constant 0 : i32
    %16 = vector.broadcast %c0_i32_9 : i32 to vector<1x256xi32>
    %17 = arith.cmpi slt, %13, %16 : vector<1x256xi32>
    %c0_i32_10 = arith.constant 0 : i32
    %18 = arith.cmpi slt, %11, %c0_i32_10 : i32
    %19 = vector.broadcast %18 : i1 to vector<1x256xi1>
    %20 = vector.broadcast %19 : vector<1x256xi1> to vector<1x256xi1>
    %21 = arith.xori %17, %20 : vector<1x256xi1>
    %22 = arith.andi %21, %15 : vector<1x256xi1>
    %23 = vector.broadcast %11 : i32 to vector<1x256xi32>
    %24 = arith.addi %13, %23 : vector<1x256xi32>
    %25 = arith.select %22, %24, %13 : vector<1x256xi1>, vector<1x256xi32>
    %c1_i32_11 = arith.constant 1 : i32
    %26 = vector.broadcast %c1_i32_11 : i32 to vector<1x256xi32>
    %27 = arith.cmpi sge, %25, %26 : vector<1x256xi32>
    %c14_i32 = arith.constant 14 : i32
    %28 = vector.broadcast %c14_i32 : i32 to vector<1x256xi32>
    %29 = arith.cmpi sle, %25, %28 : vector<1x256xi32>
    %c0_12 = arith.constant 0 : index
    %c0_13 = arith.constant 0 : index
    %30 = vector.load %arg7[%c0_12, %c0_13] : memref<4x290xf32, #tpu.memory_space<vmem>>, vector<4x256xf32>
    %cst_14 = arith.constant 0.000000e+00 : f32
    %31 = vector.shape_cast %27 : vector<1x256xi1> to vector<1x256xi1>
    %32 = vector.broadcast %31 : vector<1x256xi1> to vector<4x256xi1>
    %33 = vector.broadcast %cst_14 : f32 to vector<4x256xf32>
    %34 = arith.select %32, %30, %33 : vector<4x256xi1>, vector<4x256xf32>
    %c0_15 = arith.constant 0 : index
    %c0_16 = arith.constant 0 : index
    %35 = vector.load %arg8[%c0_15, %c0_16] : memref<36x256xf32, #tpu.memory_space<vmem>>, vector<4x256xf32>
    tpu.vector_store %arg8[%c0_15, %c0_16], %34 {strides = array<i32>} : memref<36x256xf32, #tpu.memory_space<vmem>>, vector<4x256xf32>,
    %c0_17 = arith.constant 0 : index
    %c1 = arith.constant 1 : index
    %36 = vector.load %arg7[%c0_17, %c1] : memref<4x290xf32, #tpu.memory_space<vmem>>, vector<4x256xf32>
    %c4 = arith.constant 4 : index
    %c0_18 = arith.constant 0 : index
    %37 = vector.load %arg8[%c4, %c0_18] : memref<36x256xf32, #tpu.memory_space<vmem>>, vector<4x256xf32>
    tpu.vector_store %arg8[%c4, %c0_18], %36 {strides = array<i32>} : memref<36x256xf32, #tpu.memory_space<vmem>>, vector<4x256xf32>,
    %c0_19 = arith.constant 0 : index
    %c2 = arith.constant 2 : index
    %38 = vector.load %arg7[%c0_19, %c2] : memref<4x290xf32, #tpu.memory_space<vmem>>, vector<4x256xf32>
    %cst_20 = arith.constant 0.000000e+00 : f32
    %39 = vector.shape_cast %29 : vector<1x256xi1> to vector<1x256xi1>
    %40 = vector.broadcast %39 : vector<1x256xi1> to vector<4x256xi1>
    %41 = vector.broadcast %cst_20 : f32 to vector<4x256xf32>
    %42 = arith.select %40, %38, %41 : vector<4x256xi1>, vector<4x256xf32>
    %c8 = arith.constant 8 : index
    %c0_21 = arith.constant 0 : index
    %43 = vector.load %arg8[%c8, %c0_21] : memref<36x256xf32, #tpu.memory_space<vmem>>, vector<4x256xf32>
    tpu.vector_store %arg8[%c8, %c0_21], %42 {strides = array<i32>} : memref<36x256xf32, #tpu.memory_space<vmem>>, vector<4x256xf32>,
    %c0_22 = arith.constant 0 : index
    %c16 = arith.constant 16 : index
    %44 = vector.load %arg7[%c0_22, %c16] : memref<4x290xf32, #tpu.memory_space<vmem>>, vector<4x256xf32>
    %cst_23 = arith.constant 0.000000e+00 : f32
    %45 = vector.shape_cast %27 : vector<1x256xi1> to vector<1x256xi1>
    %46 = vector.broadcast %45 : vector<1x256xi1> to vector<4x256xi1>
    %47 = vector.broadcast %cst_23 : f32 to vector<4x256xf32>
    %48 = arith.select %46, %44, %47 : vector<4x256xi1>, vector<4x256xf32>
    %c12 = arith.constant 12 : index
    %c0_24 = arith.constant 0 : index
    %49 = vector.load %arg8[%c12, %c0_24] : memref<36x256xf32, #tpu.memory_space<vmem>>, vector<4x256xf32>
    tpu.vector_store %arg8[%c12, %c0_24], %48 {strides = array<i32>} : memref<36x256xf32, #tpu.memory_space<vmem>>, vector<4x256xf32>,
    %c0_25 = arith.constant 0 : index
    %c17_26 = arith.constant 17 : index
    %50 = vector.load %arg7[%c0_25, %c17_26] : memref<4x290xf32, #tpu.memory_space<vmem>>, vector<4x256xf32>
    %c16_27 = arith.constant 16 : index
    %c0_28 = arith.constant 0 : index
    %51 = vector.load %arg8[%c16_27, %c0_28] : memref<36x256xf32, #tpu.memory_space<vmem>>, vector<4x256xf32>
    tpu.vector_store %arg8[%c16_27, %c0_28], %50 {strides = array<i32>} : memref<36x256xf32, #tpu.memory_space<vmem>>, vector<4x256xf32>,
    %c0_29 = arith.constant 0 : index
    %c18 = arith.constant 18 : index
    %52 = vector.load %arg7[%c0_29, %c18] : memref<4x290xf32, #tpu.memory_space<vmem>>, vector<4x256xf32>
    %cst_30 = arith.constant 0.000000e+00 : f32
    %53 = vector.shape_cast %29 : vector<1x256xi1> to vector<1x256xi1>
    %54 = vector.broadcast %53 : vector<1x256xi1> to vector<4x256xi1>
    %55 = vector.broadcast %cst_30 : f32 to vector<4x256xf32>
    %56 = arith.select %54, %52, %55 : vector<4x256xi1>, vector<4x256xf32>
    %c20 = arith.constant 20 : index
    %c0_31 = arith.constant 0 : index
    %57 = vector.load %arg8[%c20, %c0_31] : memref<36x256xf32, #tpu.memory_space<vmem>>, vector<4x256xf32>
    tpu.vector_store %arg8[%c20, %c0_31], %56 {strides = array<i32>} : memref<36x256xf32, #tpu.memory_space<vmem>>, vector<4x256xf32>,
    %c0_32 = arith.constant 0 : index
    %c32 = arith.constant 32 : index
    %58 = vector.load %arg7[%c0_32, %c32] : memref<4x290xf32, #tpu.memory_space<vmem>>, vector<4x256xf32>
    %cst_33 = arith.constant 0.000000e+00 : f32
    %59 = vector.shape_cast %27 : vector<1x256xi1> to vector<1x256xi1>
    %60 = vector.broadcast %59 : vector<1x256xi1> to vector<4x256xi1>
    %61 = vector.broadcast %cst_33 : f32 to vector<4x256xf32>
    %62 = arith.select %60, %58, %61 : vector<4x256xi1>, vector<4x256xf32>
    %c24 = arith.constant 24 : index
    %c0_34 = arith.constant 0 : index
    %63 = vector.load %arg8[%c24, %c0_34] : memref<36x256xf32, #tpu.memory_space<vmem>>, vector<4x256xf32>
    tpu.vector_store %arg8[%c24, %c0_34], %62 {strides = array<i32>} : memref<36x256xf32, #tpu.memory_space<vmem>>, vector<4x256xf32>,
    %c0_35 = arith.constant 0 : index
    %c33 = arith.constant 33 : index
    %64 = vector.load %arg7[%c0_35, %c33] : memref<4x290xf32, #tpu.memory_space<vmem>>, vector<4x256xf32>
    %c28 = arith.constant 28 : index
    %c0_36 = arith.constant 0 : index
    %65 = vector.load %arg8[%c28, %c0_36] : memref<36x256xf32, #tpu.memory_space<vmem>>, vector<4x256xf32>
    tpu.vector_store %arg8[%c28, %c0_36], %64 {strides = array<i32>} : memref<36x256xf32, #tpu.memory_space<vmem>>, vector<4x256xf32>,
    %c0_37 = arith.constant 0 : index
    %c34 = arith.constant 34 : index
    %66 = vector.load %arg7[%c0_37, %c34] : memref<4x290xf32, #tpu.memory_space<vmem>>, vector<4x256xf32>
    %cst_38 = arith.constant 0.000000e+00 : f32
    %67 = vector.shape_cast %29 : vector<1x256xi1> to vector<1x256xi1>
    %68 = vector.broadcast %67 : vector<1x256xi1> to vector<4x256xi1>
    %69 = vector.broadcast %cst_38 : f32 to vector<4x256xf32>
    %70 = arith.select %68, %66, %69 : vector<4x256xi1>, vector<4x256xf32>
    %c32_39 = arith.constant 32 : index
    %c0_40 = arith.constant 0 : index
    %71 = vector.load %arg8[%c32_39, %c0_40] : memref<36x256xf32, #tpu.memory_space<vmem>>, vector<4x256xf32>
    tpu.vector_store %arg8[%c32_39, %c0_40], %70 {strides = array<i32>} : memref<36x256xf32, #tpu.memory_space<vmem>>, vector<4x256xf32>,
    %c0_41 = arith.constant 0 : index
    %c0_42 = arith.constant 0 : index
    %72 = vector.load %arg3[%c0_41, %c0_42] : memref<4x36xf32, #tpu.memory_space<vmem>>, vector<4x36xf32>
    %c0_43 = arith.constant 0 : index
    %c0_44 = arith.constant 0 : index
    %73 = vector.load %arg8[%c0_43, %c0_44] : memref<36x256xf32, #tpu.memory_space<vmem>>, vector<36x256xf32>
    %cst_45 = arith.constant dense<0.000000e+00> : vector<4x256xf32>
    %74 = tpu.matmul %72, %73, %cst_45 {dimension_numbers = #tpu.dot_dimension_numbers<[1], [0], [0], [1], [0, 0, 1, 1], [], []>} : vector<4x36xf32>, vector<36x256xf32>, vector<4x256xf32> -> vector<4x256xf32>
    %c0_46 = arith.constant 0 : index
    %c0_47 = arith.constant 0 : index
    %75 = vector.load %arg4[%c0_46, %c0_47] : memref<4x1xf32, #tpu.memory_space<vmem>>, vector<4x1xf32>
    %76 = vector.broadcast %75 : vector<4x1xf32> to vector<4x256xf32>
    %77 = arith.mulf %74, %76 : vector<4x256xf32>
    %c0_48 = arith.constant 0 : index
    %c0_49 = arith.constant 0 : index
    %78 = vector.load %arg5[%c0_48, %c0_49] : memref<4x1xf32, #tpu.memory_space<vmem>>, vector<4x1xf32>
    %79 = vector.broadcast %78 : vector<4x1xf32> to vector<4x256xf32>
    %80 = arith.addf %77, %79 : vector<4x256xf32>
    %cst_50 = arith.constant 0.000000e+00 : f32
    %81 = vector.broadcast %cst_50 : f32 to vector<4x256xf32>
    %82 = arith.maximumf %80, %81 : vector<4x256xf32>
    %c0_51 = arith.constant 0 : index
    %c0_52 = arith.constant 0 : index
    %c0_53 = arith.constant 0 : index
    %83 = vector.load %arg6[%c0_51, %c0_52, %c0_53] : memref<1x4x256xf32, #tpu.memory_space<vmem>>, vector<1x4x256xf32>
    %84 = vector.shape_cast %83 : vector<1x4x256xf32> to vector<4x256xf32>
    %85 = vector.shape_cast %82 : vector<4x256xf32> to vector<1x4x256xf32>
    tpu.vector_store %arg6[%c0_51, %c0_52, %c0_53], %85 {strides = array<i32>} : memref<1x4x256xf32, #tpu.memory_space<vmem>>, vector<1x4x256xf32>,
    return
  }
  func.func @transform_0(%arg0: i32) -> (i32, i32, i32) {
    %c0_i32 = arith.constant 0 : i32
    %c0_i32_0 = arith.constant 0 : i32
    %c0_i32_1 = arith.constant 0 : i32
    return %arg0, %c0_i32, %c0_i32_0 : i32, i32, i32
  }
  func.func @transform_1(%arg0: i32) -> (i32, i32, i32) {
    %c0_i32 = arith.constant 0 : i32
    %c0_i32_0 = arith.constant 0 : i32
    %c0_i32_1 = arith.constant 0 : i32
    return %arg0, %c0_i32, %c0_i32_0 : i32, i32, i32
  }
  func.func @transform_2(%arg0: i32) -> (i32, i32) {
    %c0_i32 = arith.constant 0 : i32
    %c0_i32_0 = arith.constant 0 : i32
    %c0_i32_1 = arith.constant 0 : i32
    return %c0_i32, %c0_i32_0 : i32, i32
  }
  func.func @transform_3(%arg0: i32) -> (i32, i32) {
    %c0_i32 = arith.constant 0 : i32
    %c0_i32_0 = arith.constant 0 : i32
    %c0_i32_1 = arith.constant 0 : i32
    return %c0_i32, %c0_i32_0 : i32, i32
  }
  func.func @transform_4(%arg0: i32) -> (i32, i32) {
    %c0_i32 = arith.constant 0 : i32
    %c0_i32_0 = arith.constant 0 : i32
    %c0_i32_1 = arith.constant 0 : i32
    return %c0_i32, %c0_i32_0 : i32, i32
  }
  func.func @transform_5(%arg0: i32) -> (i32, i32, i32) {
    %c0_i32 = arith.constant 0 : i32
    %c0_i32_0 = arith.constant 0 : i32
    %c0_i32_1 = arith.constant 0 : i32
    return %arg0, %c0_i32, %c0_i32_0 : i32, i32, i32
  }
}

module attributes {stable_mosaic.version = 11 : i64} {
  func.func @_conv1x1_kernel(%arg0: i32, %arg1: i32, %arg2: memref<1x16x256xf32, #tpu.memory_space<vmem>>, %arg3: memref<16x16xf32, #tpu.memory_space<vmem>>, %arg4: memref<16x1xf32, #tpu.memory_space<vmem>>, %arg5: memref<16x1xf32, #tpu.memory_space<vmem>>, %arg6: memref<1x16x256xf32, #tpu.memory_space<vmem>>) attributes {dimension_semantics = [#tpu.dimension_semantics<parallel>, #tpu.dimension_semantics<parallel>], iteration_bounds = array<i64: 2, 1>, scalar_prefetch = 0 : i64, scratch_operands = 0 : i64, tpu.core_type = #tpu.core_type<tc>, window_params = [{transform_indices = @transform_0, window_bounds = array<i64: 1, 16, 256>}, {pipeline_mode = #tpu.pipeline_mode<synchronous>, transform_indices = @transform_1, window_bounds = array<i64: 16, 16>}, {pipeline_mode = #tpu.pipeline_mode<synchronous>, transform_indices = @transform_2, window_bounds = array<i64: 16, 1>}, {pipeline_mode = #tpu.pipeline_mode<synchronous>, transform_indices = @transform_3, window_bounds = array<i64: 16, 1>}, {transform_indices = @transform_4, window_bounds = array<i64: 1, 16, 256>}]} {
    %c0 = arith.constant 0 : index
    %c0_0 = arith.constant 0 : index
    %0 = vector.load %arg3[%c0, %c0_0] : memref<16x16xf32, #tpu.memory_space<vmem>>, vector<16x16xf32>
    %c0_1 = arith.constant 0 : index
    %c0_2 = arith.constant 0 : index
    %c0_3 = arith.constant 0 : index
    %1 = vector.load %arg2[%c0_1, %c0_2, %c0_3] : memref<1x16x256xf32, #tpu.memory_space<vmem>>, vector<1x16x256xf32>
    %2 = vector.shape_cast %1 : vector<1x16x256xf32> to vector<16x256xf32>
    %cst = arith.constant dense<0.000000e+00> : vector<16x256xf32>
    %3 = tpu.matmul %0, %2, %cst {dimension_numbers = #tpu.dot_dimension_numbers<[1], [0], [0], [1], [0, 0, 1, 1], [], []>} : vector<16x16xf32>, vector<16x256xf32>, vector<16x256xf32> -> vector<16x256xf32>
    %c0_4 = arith.constant 0 : index
    %c0_5 = arith.constant 0 : index
    %4 = vector.load %arg4[%c0_4, %c0_5] : memref<16x1xf32, #tpu.memory_space<vmem>>, vector<16x1xf32>
    %5 = vector.broadcast %4 : vector<16x1xf32> to vector<16x256xf32>
    %6 = arith.mulf %3, %5 : vector<16x256xf32>
    %c0_6 = arith.constant 0 : index
    %c0_7 = arith.constant 0 : index
    %7 = vector.load %arg5[%c0_6, %c0_7] : memref<16x1xf32, #tpu.memory_space<vmem>>, vector<16x1xf32>
    %8 = vector.broadcast %7 : vector<16x1xf32> to vector<16x256xf32>
    %9 = arith.addf %6, %8 : vector<16x256xf32>
    %cst_8 = arith.constant 0.000000e+00 : f32
    %10 = vector.broadcast %cst_8 : f32 to vector<16x256xf32>
    %11 = arith.maximumf %9, %10 : vector<16x256xf32>
    %c0_9 = arith.constant 0 : index
    %c0_10 = arith.constant 0 : index
    %c0_11 = arith.constant 0 : index
    %12 = vector.load %arg6[%c0_9, %c0_10, %c0_11] : memref<1x16x256xf32, #tpu.memory_space<vmem>>, vector<1x16x256xf32>
    %13 = vector.shape_cast %12 : vector<1x16x256xf32> to vector<16x256xf32>
    %14 = vector.shape_cast %11 : vector<16x256xf32> to vector<1x16x256xf32>
    tpu.vector_store %arg6[%c0_9, %c0_10, %c0_11], %14 {strides = array<i32>} : memref<1x16x256xf32, #tpu.memory_space<vmem>>, vector<1x16x256xf32>,
    return
  }
  func.func @transform_0(%arg0: i32, %arg1: i32) -> (i32, i32, i32) {
    %c0_i32 = arith.constant 0 : i32
    %c0_i32_0 = arith.constant 0 : i32
    return %arg0, %c0_i32, %arg1 : i32, i32, i32
  }
  func.func @transform_1(%arg0: i32, %arg1: i32) -> (i32, i32) {
    %c0_i32 = arith.constant 0 : i32
    %c0_i32_0 = arith.constant 0 : i32
    %c0_i32_1 = arith.constant 0 : i32
    return %c0_i32, %c0_i32_0 : i32, i32
  }
  func.func @transform_2(%arg0: i32, %arg1: i32) -> (i32, i32) {
    %c0_i32 = arith.constant 0 : i32
    %c0_i32_0 = arith.constant 0 : i32
    %c0_i32_1 = arith.constant 0 : i32
    return %c0_i32, %c0_i32_0 : i32, i32
  }
  func.func @transform_3(%arg0: i32, %arg1: i32) -> (i32, i32) {
    %c0_i32 = arith.constant 0 : i32
    %c0_i32_0 = arith.constant 0 : i32
    %c0_i32_1 = arith.constant 0 : i32
    return %c0_i32, %c0_i32_0 : i32, i32
  }
  func.func @transform_4(%arg0: i32, %arg1: i32) -> (i32, i32, i32) {
    %c0_i32 = arith.constant 0 : i32
    %c0_i32_0 = arith.constant 0 : i32
    return %arg0, %c0_i32, %arg1 : i32, i32, i32
  }
}

module attributes {stable_mosaic.version = 11 : i64} {
  func.func @_concat_conv1x1_kernel(%arg0: i32, %arg1: i32, %arg2: memref<1x4x256xf32, #tpu.memory_space<vmem>>, %arg3: memref<1x4x256xf32, #tpu.memory_space<vmem>>, %arg4: memref<1x4x256xf32, #tpu.memory_space<vmem>>, %arg5: memref<1x4x256xf32, #tpu.memory_space<vmem>>, %arg6: memref<1x4x256xf32, #tpu.memory_space<vmem>>, %arg7: memref<5x16x4xf32, #tpu.memory_space<vmem>>, %arg8: memref<16x1xf32, #tpu.memory_space<vmem>>, %arg9: memref<16x1xf32, #tpu.memory_space<vmem>>, %arg10: memref<1x16x256xf32, #tpu.memory_space<vmem>>, %arg11: memref<1x16x256xf32, #tpu.memory_space<vmem>>) attributes {dimension_semantics = [#tpu.dimension_semantics<parallel>, #tpu.dimension_semantics<parallel>], iteration_bounds = array<i64: 2, 1>, scalar_prefetch = 0 : i64, scratch_operands = 0 : i64, tpu.core_type = #tpu.core_type<tc>, window_params = [{transform_indices = @transform_0, window_bounds = array<i64: 1, 4, 256>}, {transform_indices = @transform_1, window_bounds = array<i64: 1, 4, 256>}, {transform_indices = @transform_2, window_bounds = array<i64: 1, 4, 256>}, {transform_indices = @transform_3, window_bounds = array<i64: 1, 4, 256>}, {transform_indices = @transform_4, window_bounds = array<i64: 1, 4, 256>}, {pipeline_mode = #tpu.pipeline_mode<synchronous>, transform_indices = @transform_5, window_bounds = array<i64: 5, 16, 4>}, {pipeline_mode = #tpu.pipeline_mode<synchronous>, transform_indices = @transform_6, window_bounds = array<i64: 16, 1>}, {pipeline_mode = #tpu.pipeline_mode<synchronous>, transform_indices = @transform_7, window_bounds = array<i64: 16, 1>}, {transform_indices = @transform_8, window_bounds = array<i64: 1, 16, 256>}, {transform_indices = @transform_9, window_bounds = array<i64: 1, 16, 256>}]} {
    %cst = arith.constant 0.000000e+00 : f32
    %0 = vector.broadcast %cst : f32 to vector<16x256xf32>
    %c0 = arith.constant 0 : index
    %c0_0 = arith.constant 0 : index
    %c0_1 = arith.constant 0 : index
    %1 = vector.load %arg7[%c0, %c0_0, %c0_1] : memref<5x16x4xf32, #tpu.memory_space<vmem>>, vector<1x16x4xf32>
    %2 = vector.shape_cast %1 : vector<1x16x4xf32> to vector<16x4xf32>
    %c0_2 = arith.constant 0 : index
    %c0_3 = arith.constant 0 : index
    %c0_4 = arith.constant 0 : index
    %3 = vector.load %arg2[%c0_2, %c0_3, %c0_4] : memref<1x4x256xf32, #tpu.memory_space<vmem>>, vector<1x4x256xf32>
    %4 = vector.shape_cast %3 : vector<1x4x256xf32> to vector<4x256xf32>
    %cst_5 = arith.constant dense<0.000000e+00> : vector<16x256xf32>
    %5 = tpu.matmul %2, %4, %cst_5 {dimension_numbers = #tpu.dot_dimension_numbers<[1], [0], [0], [1], [0, 0, 1, 1], [], []>} : vector<16x4xf32>, vector<4x256xf32>, vector<16x256xf32> -> vector<16x256xf32>
    %6 = arith.addf %0, %5 : vector<16x256xf32>
    %c1 = arith.constant 1 : index
    %c0_6 = arith.constant 0 : index
    %c0_7 = arith.constant 0 : index
    %7 = vector.load %arg7[%c1, %c0_6, %c0_7] : memref<5x16x4xf32, #tpu.memory_space<vmem>>, vector<1x16x4xf32>
    %8 = vector.shape_cast %7 : vector<1x16x4xf32> to vector<16x4xf32>
    %c0_8 = arith.constant 0 : index
    %c0_9 = arith.constant 0 : index
    %c0_10 = arith.constant 0 : index
    %9 = vector.load %arg3[%c0_8, %c0_9, %c0_10] : memref<1x4x256xf32, #tpu.memory_space<vmem>>, vector<1x4x256xf32>
    %10 = vector.shape_cast %9 : vector<1x4x256xf32> to vector<4x256xf32>
    %cst_11 = arith.constant dense<0.000000e+00> : vector<16x256xf32>
    %11 = tpu.matmul %8, %10, %cst_11 {dimension_numbers = #tpu.dot_dimension_numbers<[1], [0], [0], [1], [0, 0, 1, 1], [], []>} : vector<16x4xf32>, vector<4x256xf32>, vector<16x256xf32> -> vector<16x256xf32>
    %12 = arith.addf %6, %11 : vector<16x256xf32>
    %c2 = arith.constant 2 : index
    %c0_12 = arith.constant 0 : index
    %c0_13 = arith.constant 0 : index
    %13 = vector.load %arg7[%c2, %c0_12, %c0_13] : memref<5x16x4xf32, #tpu.memory_space<vmem>>, vector<1x16x4xf32>
    %14 = vector.shape_cast %13 : vector<1x16x4xf32> to vector<16x4xf32>
    %c0_14 = arith.constant 0 : index
    %c0_15 = arith.constant 0 : index
    %c0_16 = arith.constant 0 : index
    %15 = vector.load %arg4[%c0_14, %c0_15, %c0_16] : memref<1x4x256xf32, #tpu.memory_space<vmem>>, vector<1x4x256xf32>
    %16 = vector.shape_cast %15 : vector<1x4x256xf32> to vector<4x256xf32>
    %cst_17 = arith.constant dense<0.000000e+00> : vector<16x256xf32>
    %17 = tpu.matmul %14, %16, %cst_17 {dimension_numbers = #tpu.dot_dimension_numbers<[1], [0], [0], [1], [0, 0, 1, 1], [], []>} : vector<16x4xf32>, vector<4x256xf32>, vector<16x256xf32> -> vector<16x256xf32>
    %18 = arith.addf %12, %17 : vector<16x256xf32>
    %c3 = arith.constant 3 : index
    %c0_18 = arith.constant 0 : index
    %c0_19 = arith.constant 0 : index
    %19 = vector.load %arg7[%c3, %c0_18, %c0_19] : memref<5x16x4xf32, #tpu.memory_space<vmem>>, vector<1x16x4xf32>
    %20 = vector.shape_cast %19 : vector<1x16x4xf32> to vector<16x4xf32>
    %c0_20 = arith.constant 0 : index
    %c0_21 = arith.constant 0 : index
    %c0_22 = arith.constant 0 : index
    %21 = vector.load %arg5[%c0_20, %c0_21, %c0_22] : memref<1x4x256xf32, #tpu.memory_space<vmem>>, vector<1x4x256xf32>
    %22 = vector.shape_cast %21 : vector<1x4x256xf32> to vector<4x256xf32>
    %cst_23 = arith.constant dense<0.000000e+00> : vector<16x256xf32>
    %23 = tpu.matmul %20, %22, %cst_23 {dimension_numbers = #tpu.dot_dimension_numbers<[1], [0], [0], [1], [0, 0, 1, 1], [], []>} : vector<16x4xf32>, vector<4x256xf32>, vector<16x256xf32> -> vector<16x256xf32>
    %24 = arith.addf %18, %23 : vector<16x256xf32>
    %c4 = arith.constant 4 : index
    %c0_24 = arith.constant 0 : index
    %c0_25 = arith.constant 0 : index
    %25 = vector.load %arg7[%c4, %c0_24, %c0_25] : memref<5x16x4xf32, #tpu.memory_space<vmem>>, vector<1x16x4xf32>
    %26 = vector.shape_cast %25 : vector<1x16x4xf32> to vector<16x4xf32>
    %c0_26 = arith.constant 0 : index
    %c0_27 = arith.constant 0 : index
    %c0_28 = arith.constant 0 : index
    %27 = vector.load %arg6[%c0_26, %c0_27, %c0_28] : memref<1x4x256xf32, #tpu.memory_space<vmem>>, vector<1x4x256xf32>
    %28 = vector.shape_cast %27 : vector<1x4x256xf32> to vector<4x256xf32>
    %cst_29 = arith.constant dense<0.000000e+00> : vector<16x256xf32>
    %29 = tpu.matmul %26, %28, %cst_29 {dimension_numbers = #tpu.dot_dimension_numbers<[1], [0], [0], [1], [0, 0, 1, 1], [], []>} : vector<16x4xf32>, vector<4x256xf32>, vector<16x256xf32> -> vector<16x256xf32>
    %30 = arith.addf %24, %29 : vector<16x256xf32>
    %c0_30 = arith.constant 0 : index
    %c0_31 = arith.constant 0 : index
    %31 = vector.load %arg8[%c0_30, %c0_31] : memref<16x1xf32, #tpu.memory_space<vmem>>, vector<16x1xf32>
    %32 = vector.broadcast %31 : vector<16x1xf32> to vector<16x256xf32>
    %33 = arith.mulf %30, %32 : vector<16x256xf32>
    %c0_32 = arith.constant 0 : index
    %c0_33 = arith.constant 0 : index
    %34 = vector.load %arg9[%c0_32, %c0_33] : memref<16x1xf32, #tpu.memory_space<vmem>>, vector<16x1xf32>
    %35 = vector.broadcast %34 : vector<16x1xf32> to vector<16x256xf32>
    %36 = arith.addf %33, %35 : vector<16x256xf32>
    %cst_34 = arith.constant 0.000000e+00 : f32
    %37 = vector.broadcast %cst_34 : f32 to vector<16x256xf32>
    %38 = arith.maximumf %36, %37 : vector<16x256xf32>
    %c0_35 = arith.constant 0 : index
    %c0_36 = arith.constant 0 : index
    %c0_37 = arith.constant 0 : index
    %39 = vector.load %arg10[%c0_35, %c0_36, %c0_37] : memref<1x16x256xf32, #tpu.memory_space<vmem>>, vector<1x16x256xf32>
    %40 = vector.shape_cast %39 : vector<1x16x256xf32> to vector<16x256xf32>
    %41 = arith.addf %38, %40 : vector<16x256xf32>
    %c0_38 = arith.constant 0 : index
    %c0_39 = arith.constant 0 : index
    %c0_40 = arith.constant 0 : index
    %42 = vector.load %arg11[%c0_38, %c0_39, %c0_40] : memref<1x16x256xf32, #tpu.memory_space<vmem>>, vector<1x16x256xf32>
    %43 = vector.shape_cast %42 : vector<1x16x256xf32> to vector<16x256xf32>
    %44 = vector.shape_cast %41 : vector<16x256xf32> to vector<1x16x256xf32>
    tpu.vector_store %arg11[%c0_38, %c0_39, %c0_40], %44 {strides = array<i32>} : memref<1x16x256xf32, #tpu.memory_space<vmem>>, vector<1x16x256xf32>,
    return
  }
  func.func @transform_0(%arg0: i32, %arg1: i32) -> (i32, i32, i32) {
    %c0_i32 = arith.constant 0 : i32
    %c0_i32_0 = arith.constant 0 : i32
    return %arg0, %c0_i32, %arg1 : i32, i32, i32
  }
  func.func @transform_1(%arg0: i32, %arg1: i32) -> (i32, i32, i32) {
    %c0_i32 = arith.constant 0 : i32
    %c0_i32_0 = arith.constant 0 : i32
    return %arg0, %c0_i32, %arg1 : i32, i32, i32
  }
  func.func @transform_2(%arg0: i32, %arg1: i32) -> (i32, i32, i32) {
    %c0_i32 = arith.constant 0 : i32
    %c0_i32_0 = arith.constant 0 : i32
    return %arg0, %c0_i32, %arg1 : i32, i32, i32
  }
  func.func @transform_3(%arg0: i32, %arg1: i32) -> (i32, i32, i32) {
    %c0_i32 = arith.constant 0 : i32
    %c0_i32_0 = arith.constant 0 : i32
    return %arg0, %c0_i32, %arg1 : i32, i32, i32
  }
  func.func @transform_4(%arg0: i32, %arg1: i32) -> (i32, i32, i32) {
    %c0_i32 = arith.constant 0 : i32
    %c0_i32_0 = arith.constant 0 : i32
    return %arg0, %c0_i32, %arg1 : i32, i32, i32
  }
  func.func @transform_5(%arg0: i32, %arg1: i32) -> (i32, i32, i32) {
    %c0_i32 = arith.constant 0 : i32
    %c0_i32_0 = arith.constant 0 : i32
    %c0_i32_1 = arith.constant 0 : i32
    %c0_i32_2 = arith.constant 0 : i32
    return %c0_i32, %c0_i32_0, %c0_i32_1 : i32, i32, i32
  }
  func.func @transform_6(%arg0: i32, %arg1: i32) -> (i32, i32) {
    %c0_i32 = arith.constant 0 : i32
    %c0_i32_0 = arith.constant 0 : i32
    %c0_i32_1 = arith.constant 0 : i32
    return %c0_i32, %c0_i32_0 : i32, i32
  }
  func.func @transform_7(%arg0: i32, %arg1: i32) -> (i32, i32) {
    %c0_i32 = arith.constant 0 : i32
    %c0_i32_0 = arith.constant 0 : i32
    %c0_i32_1 = arith.constant 0 : i32
    return %c0_i32, %c0_i32_0 : i32, i32
  }
  func.func @transform_8(%arg0: i32, %arg1: i32) -> (i32, i32, i32) {
    %c0_i32 = arith.constant 0 : i32
    %c0_i32_0 = arith.constant 0 : i32
    return %arg0, %c0_i32, %arg1 : i32, i32, i32
  }
  func.func @transform_9(%arg0: i32, %arg1: i32) -> (i32, i32, i32) {
    %c0_i32 = arith.constant 0 : i32
    %c0_i32_0 = arith.constant 0 : i32
    return %arg0, %c0_i32, %arg1 : i32, i32, i32
  }
}

</mosaic_0001>

<bundles_post_ra>
// kernel: dappm_forward.13
= control target key start
LH: loop header
LB: loop body
LE: loop exit
PB: predicated region body
PF: predicated region fallthrough
CT: control target
= control target key end

     0   :  { %s504_s15 = smov 0   ;;  %s506_s16 = smov 0   ;;  %s546_s0 = inlined_call_operand.vmem [shape: f32[2,16,64], index: 0, kind: input, shape index: {}]   ;;  %s547_s1 = inlined_call_operand.vmem [shape: f32[4,16], index: 1, kind: input, shape index: {}]   ;;  %s548_s2 = inlined_call_operand.vmem [shape: f32[4,1], index: 2, kind: input, shape index: {}]   ;;  %s549_s3 = inlined_call_operand.vmem [shape: f32[4,1], index: 3, kind: input, shape index: {}]   ;;  %s550_s4 = inlined_call_operand.vmem [shape: f32[2,4,64], index: 4, kind: output, shape index: {}]  }
   0x1   :  { %s508_s17 = smov 0  }
   0x2 LB: > { %s26_s18 = sadd.s32 1, %s469_s16  ;;  %p401_p0 = scmp.ge.s32.totalorder %s473_s17, 1  ;;  %s473_s17 = sphi %s508_s17, %s14_s17   ;;  %s469_s16 = sphi %s506_s16, %s552_s16   ;;  %s465_s15 = sphi %s504_s15, %s551_s15  }
   0x3   : > { %p28_p1 = scmp.ge.s32.totalorder %s26_s18, 2  ;;  %p181_p2 = scmp.lt.s32.totalorder %s473_s17, 3 }
   0x5   : > { %s554_s18 = smov (%p28_p1, %s26_s18), 0  ;;  %p182_p3 = pnand %p401_p0, %p181_p2 }
   0x6   : > { %p212_p4 = scmp.lt.s32.totalorder (!%p182_p3), %s465_s15, 1  ;;  %v475_v0 = vmov (!%p182_p3), 0.0|0.0   ;;  %vm476_vm0 = vmmov (!%p182_p3), 0   ;;  %v477_v1 = vmov (!%p182_p3), 0.0   ;;  %v304_v2 = vld [vmem:[%s548_s2] sm:$0xf] (!%p182_p3) }
   0x7   : > { %185 = sbr.rel (%p182_p3) target bundleno = 240 (0xf0), region = 36  ;;  %419 = vmatprep.subr.bf16.mxu0 (!%p182_p3), %v475_v0  ;;  %416 = vmatprep.mubr.msk.f32.mxu0 (!%p182_p3), %vm476_vm0, %v477_v1  ;;  %v478_v3 = vmov (!%p182_p3), 0   ;;  %v311_v4 = vld [vmem:[%s549_s3] sm:$0xf] (!%p182_p3)  ;;  %vm230_vm1 = vcmask (!%p182_p3), 130048   ;;  %vm318_vm2 = vcmask (!%p182_p3), 519168  }
   0x8   : > { %450 = vset.pattern.permute.xlu0 (!%p182_p3), %v478_v3  ;;  %v227_v8 = vld [vmem:[%s547_s1] sm:$0xf] (!%p182_p3) }
   0x9   : > { %307 = vperm.xlu0 (!%p182_p3), %450, %v304_v2  }
   0xd   : > { %314 = vperm.xlu0 (!%p182_p3), %450, %v311_v4  }
   0xe   : > { %s556_s15 = smov (!%p212_p4, %s465_s15), 1 }
   0xf   : > { %s408_s21 = sshll.u32 %s556_s15, 4  ;;  %s404_s29 = sshll.u32 %s556_s15, 2 }
  0x10   : > { %s219_s26 = scalar_lea.vmem %s546_s0, %s408_s21  ;;  %s226_s6 = scalar_lea.vmem %s550_s4, %s404_s29 }
  0x11   : > { %v228_v5 = vld [vmem:[%s219_s26] sm:$0xff]  ;;  %v229_v6 = vld [vmem:[%s219_s26 + $0x8] sm:$0xff] }
  0x12   : > { %v420_v7 = vpack.c.bf16 %v229_v6, %v228_v5 }
  0x14   : > { %421 = vmatpush3.bf16.msra.mxu0 %v420_v7 }
  0x17   : > { %417 = vmatmul.mubr.msk.f32.vlgmr.msra.gmra.mrb[0].mxu0 %vm230_vm1, %v227_v8 }
  0x88   : > { %v308_v9 = vpop.permute.xlu0 %307 }
  0x8c   : > { %v315_v13 = vpop.permute.xlu0 %314 }
  0xea   : > { %v300_v10 = vpop.f32.mrb[0].mxu0 }
  0xeb   : > { %v310_v11 = vmul.f32 %v308_v9, %v300_v10  ;;  %v418_v12 = vpop.f32.mrb[1].mxu0 }
  0xed   : > { %v317_v14 = vadd.f32 %v315_v13, %v310_v11 }
  0xef   : > { %319 = vst.msk [vmem:[%s226_s6] sm:$0xf] %vm318_vm2, %v317_v14 }
  0xf0 PF: > { %s14_s17 = sadd.s32 1, %s473_s17   ;;  %s551_s15 = smov %s469_s16 }
  0xf1   : > { %p11_p5 = scmp.ge.s32.totalorder %s14_s17, 4   ;;  %s552_s16 = smov %s554_s18 }
  0xf3   :  { %13 = sbr.rel (!%p11_p5) target bundleno = 2 (0x2), region = 66 }

// kernel: dappm_forward.12
= control target key start
LH: loop header
LB: loop body
LE: loop exit
PB: predicated region body
PF: predicated region fallthrough
CT: control target
= control target key end

     0   :  { %s523_s15 = smov 0   ;;  %s525_s16 = smov 0   ;;  %s569_s0 = inlined_call_operand.vmem [shape: f32[2,16,256], index: 0, kind: input, shape index: {}]   ;;  %s570_s1 = inlined_call_operand.vmem [shape: f32[4,16], index: 1, kind: input, shape index: {}]   ;;  %s571_s2 = inlined_call_operand.vmem [shape: f32[4,1], index: 2, kind: input, shape index: {}]   ;;  %s572_s3 = inlined_call_operand.vmem [shape: f32[4,1], index: 3, kind: input, shape index: {}]   ;;  %s573_s4 = inlined_call_operand.vmem [shape: f32[2,4,256], index: 4, kind: output, shape index: {}]  }
   0x1   :  { %s527_s17 = smov 0  }
   0x2 LB: > { %s26_s18 = sadd.s32 1, %s490_s16  ;;  %p431_p0 = scmp.ge.s32.totalorder %s494_s17, 1  ;;  %s494_s17 = sphi %s527_s17, %s14_s17   ;;  %s490_s16 = sphi %s525_s16, %s575_s16   ;;  %s486_s15 = sphi %s523_s15, %s574_s15  }
   0x3   : > { %p28_p1 = scmp.ge.s32.totalorder %s26_s18, 2  ;;  %p183_p2 = scmp.lt.s32.totalorder %s494_s17, 3 }
   0x5   : > { %s577_s18 = smov (%p28_p1, %s26_s18), 0  ;;  %p184_p3 = pnand %p431_p0, %p183_p2 }
   0x6   : > { %p218_p4 = scmp.lt.s32.totalorder (!%p184_p3), %s486_s15, 1  ;;  %v496_v0 = vmov (!%p184_p3), 0.0   ;;  %v497_v1 = vmov (!%p184_p3), 0   ;;  %v317_v2 = vld [vmem:[%s571_s2] sm:$0xf] (!%p184_p3)  ;;  %vm242_vm0 = vcmask (!%p184_p3), 130048  }
   0x7   : > { %187 = sbr.rel (%p184_p3) target bundleno = 246 (0xf6), region = 36  ;;  %310 = vmatprep.mubr.f32.mxu0 (!%p184_p3), %v496_v0  ;;  %471 = vset.pattern.permute.xlu0 (!%p184_p3), %v497_v1  ;;  %v325_v3 = vld [vmem:[%s572_s3] sm:$0xf] (!%p184_p3) }
   0x8   : > { %320 = vperm.xlu0 (!%p184_p3), %471, %v317_v2   ;;  %v237_v10 = vld [vmem:[%s570_s1] sm:$0xf] (!%p184_p3) }
   0xc   : > { %328 = vperm.xlu0 (!%p184_p3), %471, %v325_v3  }
   0xe   : > { %s579_s15 = smov (!%p218_p4, %s486_s15), 1 }
   0xf   : > { %s439_s23 = sshll.u32 %s579_s15, 5  ;;  %s440_s29 = sshll.u32 %s579_s15, 3 }
  0x10   : > { %s225_s26 = scalar_lea.vmem %s569_s0, %s439_s23  ;;  %s235_s6 = scalar_lea.vmem %s573_s4, %s440_s29 }
  0x11   : > { %v239_v4 = vld [vmem:[%s225_s26 + $0x8] sm:$0xff]  ;;  %v241_v5 = vld [vmem:[%s225_s26 + $0x18] sm:$0xff]  ;;  %v238_v6 = vld [vmem:[%s225_s26] sm:$0xff] }
  0x12   : > { %v441_v7 = vpack.c.bf16 %v241_v5, %v239_v4  ;;  %v240_v8 = vld [vmem:[%s225_s26 + $0x10] sm:$0xff] }
  0x13   : > { %v443_v9 = vpack.c.bf16 %v240_v8, %v238_v6 }
  0x14   : > { %442 = vmatprep.subr.bf16.mxu0 %v441_v7 }
  0x15   : > { %444 = vmatpush1.bf16.msra.mxu0 %v443_v9 }
  0x18   : > { %436 = vmatmul.mubr.msk.f32.vlgmr.msra.gmra.mrb[0].mxu0 %vm242_vm0, %v237_v10 }
  0x87   : > { %v321_v11 = vpop.permute.xlu0 %320 }
  0x8b   : > { %v329_v15 = vpop.permute.xlu0 %328 }
  0xeb   : > { %v312_v12 = vpop.f32.mrb[0].mxu0 }
  0xec   : > { %v323_v13 = vmul.f32 %v321_v11, %v312_v12  ;;  %v314_v14 = vpop.f32.mrb[1].mxu0 }
  0xed   : > { %v324_v16 = vmul.f32 %v321_v11, %v314_v14 }
  0xee   : > { %v331_v17 = vadd.f32 %v329_v15, %v323_v13 }
  0xef   : > { %v332_v18 = vadd.f32 %v329_v15, %v324_v16 }
  0xf0   : > { %v333_v19 = vmax.f32 %v331_v17, 0.0 }
  0xf1   : > { %v334_v20 = vmax.f32 %v332_v18, 0.0 }
  0xf3   : > { %v337_v21 = vcombine.low %v333_v19, %v334_v20 }
  0xf5   : > { %339 = vst [vmem:[%s235_s6] sm:$0xff] %v337_v21 }
  0xf6 PF: > { %s14_s17 = sadd.s32 1, %s494_s17   ;;  %s574_s15 = smov %s490_s16 }
  0xf7   : > { %p11_p5 = scmp.ge.s32.totalorder %s14_s17, 4   ;;  %s575_s16 = smov %s577_s18 }
  0xf9   :  { %13 = sbr.rel (!%p11_p5) target bundleno = 2 (0x2), region = 66 }

// kernel: dappm_forward.14
= control target key start
LH: loop header
LB: loop body
LE: loop exit
PB: predicated region body
PF: predicated region fallthrough
CT: control target
= control target key end

     0   :  { %s764_s18 = smov 0   ;;  %s872_s0 = inlined_call_operand.vmem [shape: f32[2,4,256], index: 0, kind: input, shape index: {}]   ;;  %s873_s1 = inlined_call_operand.vmem [shape: f32[2,4,256], index: 1, kind: input, shape index: {}]   ;;  %s874_s2 = inlined_call_operand.vmem [shape: f32[4,36], index: 2, kind: input, shape index: {}]   ;;  %s875_s3 = inlined_call_operand.vmem [shape: f32[4,1], index: 3, kind: input, shape index: {}]   ;;  %s876_s4 = inlined_call_operand.vmem [shape: f32[4,1], index: 4, kind: input, shape index: {}]   ;;  %s877_s5 = inlined_call_operand.vmem [shape: f32[2,4,256], index: 5, kind: output, shape index: {}]  }
   0x1 LB: > { %s663_s19 = sadd.s32 4294967295, %s721_s18   ;;  %p667_p0 = scmp.ge.s32.totalorder %s721_s18, 1  ;;  %s721_s18 = sphi %s764_s18, %s15_s18  }
   0x2   : > { %p197_p1 = scmp.lt.s32.totalorder %s721_s18, 3 }
   0x4   : > { %p198_p2 = pnand %p667_p0, %p197_p1 }
   0x5   : > { %p230_p3 = scmp.lt.s32.totalorder (!%p198_p2), %s663_s19, 1  ;;  %vm246_vm0 = vcmask (!%p198_p2), 273408   ;;  %v723_v0 = vmov (!%p198_p2), 0.0   ;;  %s724_s27 = smov (!%p198_p2), 17   ;;  %v265_v4 = vlaneseq (!%p198_p2)  ;;  %vm259_vm1 = vcmask (!%p198_p2), 1043592  }
   0x6   : > { %201 = sbr.rel (%p198_p2) target bundleno = 539 (0x21b), region = 40  ;;  %245 = vst [vmem:[#allocation2] sm:$0xff] (!%p198_p2), %v723_v0  ;;  %247 = vst.msk [vmem:[#allocation2 + $0x8] sm:$0xf] (!%p198_p2), %vm246_vm0, %v723_v0  ;;  %566 = vmatprep.mubr.f32.mxu0 (!%p198_p2), %v723_v0  ;;  %vm260_vm2 = vcmask (!%p198_p2), 1047556   ;;  %vm255_vm3 = vcmask (!%p198_p2), 138240  }
   0x7   : > { %v782_v5 = vand.u32 (!%p198_p2), 127, %v265_v4  ;;  %vm263_vm4 = vcmask (!%p198_p2), 134144   ;;  %vm261_vm5 = vmor (!%p198_p2), %vm260_vm2, %vm259_vm1  ;;  %s725_s28 = smov (!%p198_p2), 96   ;;  %s726_s29 = smov (!%p198_p2), 112   ;;  %v733_v27 = vmov (!%p198_p2), 0   ;;  %vm320_vm8 = vcmask (!%p198_p2), 1039360  }
   0x8   : > { %s727_s30 = smov (!%p198_p2), 111   ;;  %s728_s6 = smov (!%p198_p2), 126   ;;  %709 = vset.pattern.permute.xlu1 (!%p198_p2), %v733_v27  ;;  %v573_v28 = vld [vmem:[%s875_s3] sm:$0xf] (!%p198_p2)  ;;  %710 = vset.pattern.permute.xlu0 (!%p198_p2), %v733_v27  ;;  %vm453_vm9 = vcmask (!%p198_p2), 777216   ;;  %vm362_vm10 = vcmask (!%p198_p2), 916480  }
   0x9   : > { %v785_v9 = vadd.s32 (!%p198_p2), 128, %v782_v5  ;;  %v272_v10 = vand.u32 (!%p198_p2), 15, %v782_v5  ;;  %s729_s7 = smov (!%p198_p2), 110   ;;  %s730_s8 = smov (!%p198_p2), 127   ;;  %v581_v29 = vld [vmem:[%s876_s4] sm:$0xf] (!%p198_p2) }
   0xa   : > { %s731_s9 = smov (!%p198_p2), 95   ;;  %s732_s10 = smov (!%p198_p2), 94   ;;  %vm342_vm11 = vcmask (!%p198_p2), 1031168   ;;  %vm406_vm14 = vcmask (!%p198_p2), 900096   ;;  %vm432_vm15 = vcmask (!%p198_p2), 785408   ;;  %vm388_vm0 = vcmask (!%p198_p2), 908288  }
   0xb   : > { %v279_v11 = vand.u32 (!%p198_p2), 15, %v785_v9  ;;  %vm791_vm6 = vcmp.ge.s32.totalorder (!%p198_p2), %v272_v10, 1  ;;  %vm830_vm12 = vcmp.le.s32.totalorder (!%p198_p2), %v272_v10, 14  ;;  %vm471_vm1 = vcmask (!%p198_p2), 769024  }
   0xc   : > { %vm495_vm2 = vcmask (!%p198_p2), 1043456  }
   0xd   : > { %s887_s19 = smov (!%p230_p3, %s663_s19), 1  ;;  %vm799_vm7 = vcmp.ge.s32.totalorder %v279_v11, 1  ;;  %vm836_vm13 = vcmp.le.s32.totalorder %v279_v11, 14 }
   0xe   : > { %s772_s20 = sshll.u32 %s887_s19, 3 }
   0xf   : > { %s234_s23 = scalar_lea.vmem %s872_s0, %s772_s20  ;;  %s239_s26 = scalar_lea.vmem %s873_s1, %s772_s20 }
  0x10   : > { %v248_v1 = vld [vmem:[%s234_s23] sm:$0xff]  ;;  %s244_s21 = scalar_lea.vmem %s877_s5, %s772_s20 }
  0x11   : > { %v249_v2 = vld [vmem:[%s239_s26] sm:$0xff] }
  0x12   : > { %v250_v3 = vadd.f32 %v249_v2, %v248_v1 }
  0x14   : > { %252 = vrot.lane.b32.xlu0 %v250_v3, %s724_s27 }
  0x86   : > { %v253_v6 = vpop.permute.xlu0 %252 }
  0x87   : > { %v254_v7 = vrot.slane %v253_v6, 4 }
  0x89   : > { %v256_v8 = vsel %vm255_vm3, %v254_v7, %v253_v6  ;;  %264 = vst.msk [vmem:[#allocation2 + $0x8] sm:$0xf] %vm263_vm4, %v254_v7  ;;  %vm491_vm3 = vcmask 293888  }
  0x8a   : > { %262 = vst.msk [vmem:[#allocation2] sm:$0xff] %vm261_vm5, %v256_v8 }
  0x90   : > { %v422_v12 = vld [vmem:[#allocation2 + $0x8] sm:$0xf] }
  0x91   : > { %v352_v13 = vld [vmem:[#allocation2 + $0x8] sm:$0xf]  ;;  %430 = vrot.lane.b32.xlu0 %v422_v12, %s725_s28  ;;  %v308_v15 = vld [vmem:[#allocation2] sm:$0xff] }
  0x92   : > { %360 = vrot.lane.b32.xlu1 %v352_v13, %s726_s29  ;;  %v355_v17 = vcombine.high %v308_v15, %v308_v15  ;;  %v304_v18 = vsel %vm791_vm6, %v308_v15, 0.0  ;;  %v378_v19 = vld [vmem:[#allocation2 + $0x8] sm:$0xf]  ;;  %v312_v25 = vcombine.low %v308_v15, %v308_v15 }
  0x93   : > { %v328_v20 = vld [vmem:[#allocation2 + $0x8] sm:$0xf]  ;;  %306 = vst [vmem:[#allocation3] sm:$0xf] %v304_v18 }
  0x94   : > { %v305_v21 = vsel %vm799_vm7, %v355_v17, 0.0  ;;  %v396_v22 = vld [vmem:[#allocation2 + $0x8] sm:$0xf] }
  0x95   : > { %386 = vrot.lane.b32.xlu0 %v378_v19, %s727_s30  ;;  %307 = vst [vmem:[#allocation3 + $0x8] sm:$0xf] %v305_v21  ;;  %v713_v23 = vld [vmem:[#allocation2 + $0x8] ss:$0 sps:$4 sm:$0xff]  }
  0x96   : > { %340 = vrot.lane.b32.xlu1 %v328_v20, %s728_s6  ;;  %v714_v24 = vld [vmem:[#allocation2 + $0x8] ss:$0 sps:$4 sm:$0xff]  }
  0x97   : > { %v461_v26 = vld [vmem:[#allocation2 + $0x8] sm:$0xf] }
  0x99   : > { %316 = vrot.lane.b32.xlu0 %v308_v15, %s730_s8 }
  0x9a   : > { %404 = vrot.lane.b32.xlu1 %v396_v22, %s729_s7 }
  0x9d   : > { %336 = vrot.lane.b32.xlu0 %v308_v15, %s728_s6 }
  0x9e   : > { %356 = vrot.lane.b32.xlu1 %v308_v15, %s726_s29 }
  0xa1   : > { %400 = vrot.lane.b32.xlu0 %v308_v15, %s729_s7 }
  0xa2   : > { %426 = vrot.lane.b32.xlu1 %v308_v15, %s725_s28 }
  0xa5   : > { %449 = vrot.lane.b32.xlu0 %v308_v15, %s731_s9 }
  0xa6   : > { %318 = vrot.lane.b32.xlu1 %v713_v23, %s730_s8 }
  0xa9   : > { %358 = vrot.lane.b32.xlu0 %v355_v17, %s726_s29 }
  0xaa   : > { %451 = vrot.lane.b32.xlu1 %v714_v24, %s731_s9 }
  0xad   : > { %338 = vrot.lane.b32.xlu0 %v355_v17, %s728_s6 }
  0xae   : > { %314 = vrot.lane.b32.xlu1 %v312_v25, %s730_s8 }
  0xb1   : > { %402 = vrot.lane.b32.xlu0 %v355_v17, %s729_s7 }
  0xb2   : > { %428 = vrot.lane.b32.xlu1 %v355_v17, %s725_s28 }
  0xb5   : > { %382 = vrot.lane.b32.xlu0 %v308_v15, %s727_s30 }
  0xb6   : > { %384 = vrot.lane.b32.xlu1 %v355_v17, %s727_s30 }
  0xb9   : > { %467 = vrot.lane.b32.xlu0 %v355_v17, %s732_s10 }
  0xba   : > { %447 = vrot.lane.b32.xlu1 %v312_v25, %s731_s9 }
  0xbd   : > { %465 = vrot.lane.b32.xlu0 %v308_v15, %s732_s10 }
  0xbe   : > { %469 = vrot.lane.b32.xlu1 %v461_v26, %s732_s10 }
  0xc1   : > { %584 = vperm.xlu0 %710, %v581_v29  }
  0xc2   : > { %576 = vperm.xlu1 %709, %v573_v28  }
 0x103   : > { %v431_v30 = vpop.permute.xlu0 %430 }
 0x104   : > { %v361_v31 = vpop.permute.xlu1 %360 }
 0x107   : > { %v817_v32 = vpop.permute.xlu0 %386 }
 0x108   : > { %v341_v33 = vpop.permute.xlu1 %340 }
 0x10b   : > { %v317_v35 = vpop.permute.xlu0 %316 }
 0x10c   : > { %v405_v34 = vpop.permute.xlu1 %404 }
 0x10f   : > { %v337_v37 = vpop.permute.xlu0 %336 }
 0x110   : > { %v357_v36 = vpop.permute.xlu1 %356 }
 0x113   : > { %v401_v39 = vpop.permute.xlu0 %400 }
 0x114   : > { %v427_v38 = vpop.permute.xlu1 %426 }
 0x117   : > { %v819_v41 = vpop.permute.xlu0 %449 }
 0x118   : > { %v319_v40 = vpop.permute.xlu1 %318 }
 0x119   : > { %v322_v42 = vsel %vm320_vm8, %v317_v35, %v319_v40 }
 0x11a   : > { %326 = vst [vmem:[#allocation3 + $0x8] sm:$0xf0] %v322_v42 }
 0x11b   : > { %v359_v44 = vpop.permute.xlu0 %358 }
 0x11c   : > { %v452_v43 = vpop.permute.xlu1 %451  ;;  %v363_v46 = vsel %vm362_vm10, %v357_v36, %v359_v44  ;;  %v364_v47 = vsel %vm362_vm10, %v359_v44, %v361_v31 }
 0x11d   : > { %v455_v45 = vsel %vm453_vm9, %v819_v41, %v452_v43  ;;  %v367_v48 = vsel %vm791_vm6, %v363_v46, 0.0  ;;  %v368_v49 = vsel %vm799_vm7, %v364_v47, 0.0 }
 0x11e   : > { %459 = vst [vmem:[#allocation3 + $0x38] sm:$0xf0] %v455_v45  ;;  %v371_v50 = vrot.slane %v367_v48, 4  ;;  %v372_v51 = vrot.slane %v368_v49, 4 }
 0x11f   : > { %v339_v54 = vpop.permute.xlu0 %338 }
 0x120   : > { %v315_v55 = vpop.permute.xlu1 %314  ;;  %375 = vst [vmem:[#allocation3 + $0x10] sm:$0xf0] %v371_v50  ;;  %376 = vst [vmem:[#allocation3 + $0x18] sm:$0xf0] %v372_v51  ;;  %v343_v56 = vsel %vm342_vm11, %v337_v37, %v339_v54  ;;  %v344_v57 = vsel %vm342_vm11, %v339_v54, %v341_v33 }
 0x121   : > { %v321_v58 = vsel %vm320_vm8, %v315_v55, %v317_v35  ;;  %v347_v59 = vsel %vm830_vm12, %v343_v56, 0.0  ;;  %v348_v60 = vsel %vm836_vm13, %v344_v57, 0.0  ;;  %v482_v14 = vld [vmem:[#allocation3 + $0x8] sm:$0xff] }
 0x122   : > { %325 = vst [vmem:[#allocation3] sm:$0xf0] %v321_v58  ;;  %349 = vst [vmem:[#allocation3 + $0x10] sm:$0xf] %v347_v59 }
 0x123   : > { %350 = vst [vmem:[#allocation3 + $0x18] sm:$0xf] %v348_v60  ;;  %v403_v61 = vpop.permute.xlu0 %402 }
 0x124   : > { %v429_v62 = vpop.permute.xlu1 %428  ;;  %v407_v63 = vsel %vm406_vm14, %v401_v39, %v403_v61  ;;  %v408_v0 = vsel %vm406_vm14, %v403_v61, %v405_v34  ;;  %v480_v34 = vld [vmem:[%s874_s2] sm:$0xf] }
 0x125   : > { %v433_v1 = vsel %vm432_vm15, %v427_v38, %v429_v62  ;;  %v434_v2 = vsel %vm432_vm15, %v429_v62, %v431_v30  ;;  %v411_v3 = vsel %vm830_vm12, %v407_v63, 0.0  ;;  %v412_v4 = vsel %vm836_vm13, %v408_v0, 0.0 }
 0x126   : > { %v437_v5 = vsel %vm791_vm6, %v433_v1, 0.0  ;;  %v438_v6 = vsel %vm799_vm7, %v434_v2, 0.0  ;;  %v415_v7 = vrot.slane %v411_v3, 4  ;;  %v416_v8 = vrot.slane %v412_v4, 4 }
 0x127   : > { %439 = vst [vmem:[#allocation3 + $0x30] sm:$0xf] %v437_v5  ;;  %440 = vst [vmem:[#allocation3 + $0x38] sm:$0xf] %v438_v6  ;;  %v383_v9 = vpop.permute.xlu0 %382 }
 0x128   : > { %v385_v10 = vpop.permute.xlu1 %384  ;;  %419 = vst [vmem:[#allocation3 + $0x20] sm:$0xf0] %v415_v7  ;;  %420 = vst [vmem:[#allocation3 + $0x28] sm:$0xf0] %v416_v8 }
 0x129   : > { %v389_v11 = vsel %vm388_vm0, %v383_v9, %v385_v10  ;;  %v390_v12 = vsel %vm388_vm0, %v385_v10, %v817_v32  ;;  %v481_v13 = vld [vmem:[#allocation3] sm:$0xff]  ;;  %v483_v16 = vld [vmem:[#allocation3 + $0x10] sm:$0xff] }
 0x12a   : > { %393 = vst [vmem:[#allocation3 + $0x20] sm:$0xf] %v389_v11  ;;  %394 = vst [vmem:[#allocation3 + $0x28] sm:$0xf] %v390_v12  ;;  %v484_v15 = vld [vmem:[#allocation3 + $0x18] sm:$0xff]  ;;  %v684_v18 = vpack.c.bf16 %v483_v16, %v481_v13 }
 0x12b   : > { %v682_v17 = vpack.c.bf16 %v484_v15, %v482_v14  ;;  %v468_v19 = vpop.permute.xlu0 %467 }
 0x12c   : > { %v448_v20 = vpop.permute.xlu1 %447 }
 0x12d   : > { %v454_v21 = vsel %vm453_vm9, %v448_v20, %v819_v41  ;;  %683 = vmatprep.subr.bf16.mxu0 %v682_v17 }
 0x12e   : > { %458 = vst [vmem:[#allocation3 + $0x30] sm:$0xf0] %v454_v21  ;;  %685 = vmatpush1.bf16.msra.mxu0 %v684_v18  ;;  %v488_v27 = vld [vmem:[#allocation3 + $0x38] sm:$0xff] }
 0x12f   : > { %v466_v22 = vpop.permute.xlu0 %465 }
 0x130   : > { %v470_v23 = vpop.permute.xlu1 %469  ;;  %v472_v24 = vsel %vm471_vm1, %v466_v22, %v468_v19 }
 0x131   : > { %v473_v25 = vsel %vm471_vm1, %v468_v19, %v470_v23  ;;  %v486_v26 = vld [vmem:[#allocation3 + $0x28] sm:$0xff]  ;;  %v476_v28 = vsel %vm830_vm12, %v472_v24, 0.0  ;;  %v485_v31 = vld [vmem:[#allocation3 + $0x20] sm:$0xff] }
 0x132   : > { %v477_v29 = vsel %vm836_vm13, %v473_v25, 0.0  ;;  %v686_v30 = vpack.c.bf16 %v488_v27, %v486_v26  ;;  %478 = vst [vmem:[#allocation3 + $0x40] sm:$0xf] %v476_v28 }
 0x133   : > { %479 = vst [vmem:[#allocation3 + $0x48] sm:$0xf] %v477_v29 }
 0x134   : > { %687 = vmatprep.subr.bf16.mxu0 %v686_v30 }
 0x135   : > { %v487_v32 = vld [vmem:[#allocation3 + $0x30] sm:$0xff] }
 0x136   : > { %v688_v33 = vpack.c.bf16 %v487_v32, %v485_v31 }
 0x138   : > { %689 = vmatpush1.bf16.msra.mxu0 %v688_v33 }
 0x139   : > { %v489_v36 = vld [vmem:[#allocation3 + $0x40] sm:$0xf] }
 0x13a   : > { %v490_v35 = vld [vmem:[#allocation3 + $0x48] sm:$0xf] }
 0x13b   : > { %674 = vmatprep.subr.msk.mxu0 %vm495_vm2, %v490_v35 }
 0x13c   : > { %675 = vmatpush1.msk.msra.mxu0 %vm495_vm2, %v489_v36 }
 0x13d   : > { %676 = vmatmul.mubr.msk.f32.vlgmr.msra.gmra.mrb[0].mxu0 %vm491_vm3, %v480_v34 }
 0x140   : > { %v585_v39 = vpop.permute.xlu0 %584 }
 0x141   : > { %v577_v37 = vpop.permute.xlu1 %576 }
 0x210   : > { %v568_v38 = vpop.f32.mrb[0].mxu0 }
 0x211   : > { %v579_v40 = vmul.f32 %v577_v37, %v568_v38  ;;  %v570_v41 = vpop.f32.mrb[1].mxu0 }
 0x212   : > { %v580_v42 = vmul.f32 %v577_v37, %v570_v41 }
 0x213   : > { %v587_v43 = vadd.f32 %v585_v39, %v579_v40 }
 0x214   : > { %v588_v44 = vadd.f32 %v585_v39, %v580_v42 }
 0x215   : > { %v589_v45 = vmax.f32 %v587_v43, 0.0 }
 0x216   : > { %v590_v46 = vmax.f32 %v588_v44, 0.0 }
 0x218   : > { %v593_v47 = vcombine.low %v589_v45, %v590_v46 }
 0x21a   : > { %595 = vst [vmem:[%s244_s21] sm:$0xff] %v593_v47 }
 0x21b PF: > { %s15_s18 = sadd.s32 1, %s721_s18  }
 0x21c   : > { %p12_p4 = scmp.ge.s32.totalorder %s15_s18, 4  }
 0x21e   :  { %14 = sbr.rel (!%p12_p4) target bundleno = 1 (0x1), region = 73 }

// kernel: dappm_forward.15
= control target key start
LH: loop header
LB: loop body
LE: loop exit
PB: predicated region body
PF: predicated region fallthrough
CT: control target
= control target key end

     0   :  { %s504_s15 = smov 0   ;;  %s506_s16 = smov 0   ;;  %s546_s0 = inlined_call_operand.vmem [shape: f32[2,16,16], index: 0, kind: input, shape index: {}]   ;;  %s547_s1 = inlined_call_operand.vmem [shape: f32[4,16], index: 1, kind: input, shape index: {}]   ;;  %s548_s2 = inlined_call_operand.vmem [shape: f32[4,1], index: 2, kind: input, shape index: {}]   ;;  %s549_s3 = inlined_call_operand.vmem [shape: f32[4,1], index: 3, kind: input, shape index: {}]   ;;  %s550_s4 = inlined_call_operand.vmem [shape: f32[2,4,16], index: 4, kind: output, shape index: {}]  }
   0x1   :  { %s508_s17 = smov 0  }
   0x2 LB: > { %s26_s18 = sadd.s32 1, %s469_s16  ;;  %p401_p0 = scmp.ge.s32.totalorder %s473_s17, 1  ;;  %s473_s17 = sphi %s508_s17, %s14_s17   ;;  %s469_s16 = sphi %s506_s16, %s552_s16   ;;  %s465_s15 = sphi %s504_s15, %s551_s15  }
   0x3   : > { %p28_p1 = scmp.ge.s32.totalorder %s26_s18, 2  ;;  %p181_p2 = scmp.lt.s32.totalorder %s473_s17, 3 }
   0x5   : > { %s554_s18 = smov (%p28_p1, %s26_s18), 0  ;;  %p182_p3 = pnand %p401_p0, %p181_p2 }
   0x6   : > { %p212_p4 = scmp.lt.s32.totalorder (!%p182_p3), %s465_s15, 1  ;;  %v475_v0 = vmov (!%p182_p3), 0.0|0.0   ;;  %vm476_vm0 = vmmov (!%p182_p3), 0   ;;  %v477_v1 = vmov (!%p182_p3), 0.0   ;;  %v304_v2 = vld [vmem:[%s548_s2] sm:$0xf] (!%p182_p3) }
   0x7   : > { %185 = sbr.rel (%p182_p3) target bundleno = 240 (0xf0), region = 36  ;;  %419 = vmatprep.subr.bf16.mxu0 (!%p182_p3), %v475_v0  ;;  %416 = vmatprep.mubr.msk.f32.mxu0 (!%p182_p3), %vm476_vm0, %v477_v1  ;;  %v478_v3 = vmov (!%p182_p3), 0   ;;  %v311_v4 = vld [vmem:[%s549_s3] sm:$0xf] (!%p182_p3)  ;;  %vm230_vm1 = vcmask (!%p182_p3), 130048   ;;  %vm318_vm2 = vcmask (!%p182_p3), 125952  }
   0x8   : > { %450 = vset.pattern.permute.xlu0 (!%p182_p3), %v478_v3  ;;  %v227_v8 = vld [vmem:[%s547_s1] sm:$0xf] (!%p182_p3) }
   0x9   : > { %307 = vperm.xlu0 (!%p182_p3), %450, %v304_v2  }
   0xd   : > { %314 = vperm.xlu0 (!%p182_p3), %450, %v311_v4  }
   0xe   : > { %s556_s15 = smov (!%p212_p4, %s465_s15), 1 }
   0xf   : > { %s408_s21 = sshll.u32 %s556_s15, 4  ;;  %s404_s29 = sshll.u32 %s556_s15, 2 }
  0x10   : > { %s219_s26 = scalar_lea.vmem %s546_s0, %s408_s21  ;;  %s226_s6 = scalar_lea.vmem %s550_s4, %s404_s29 }
  0x11   : > { %v228_v5 = vld [vmem:[%s219_s26] sm:$0xff]  ;;  %v229_v6 = vld [vmem:[%s219_s26 + $0x8] sm:$0xff] }
  0x12   : > { %v420_v7 = vpack.c.bf16 %v229_v6, %v228_v5 }
  0x14   : > { %421 = vmatpush3.bf16.msra.mxu0 %v420_v7 }
  0x17   : > { %417 = vmatmul.mubr.msk.f32.vlgmr.msra.gmra.mrb[0].mxu0 %vm230_vm1, %v227_v8 }
  0x88   : > { %v308_v9 = vpop.permute.xlu0 %307 }
  0x8c   : > { %v315_v13 = vpop.permute.xlu0 %314 }
  0xea   : > { %v300_v10 = vpop.f32.mrb[0].mxu0 }
  0xeb   : > { %v310_v11 = vmul.f32 %v308_v9, %v300_v10  ;;  %v418_v12 = vpop.f32.mrb[1].mxu0 }
  0xed   : > { %v317_v14 = vadd.f32 %v315_v13, %v310_v11 }
  0xef   : > { %319 = vst.msk [vmem:[%s226_s6] sm:$0xf] %vm318_vm2, %v317_v14 }
  0xf0 PF: > { %s14_s17 = sadd.s32 1, %s473_s17   ;;  %s551_s15 = smov %s469_s16 }
  0xf1   : > { %p11_p5 = scmp.ge.s32.totalorder %s14_s17, 4   ;;  %s552_s16 = smov %s554_s18 }
  0xf3   :  { %13 = sbr.rel (!%p11_p5) target bundleno = 2 (0x2), region = 66 }

// kernel: dappm_forward.17
= control target key start
LH: loop header
LB: loop body
LE: loop exit
PB: predicated region body
PF: predicated region fallthrough
CT: control target
= control target key end

     0   :  { %s504_s15 = smov 0   ;;  %s506_s16 = smov 0   ;;  %s546_s0 = inlined_call_operand.vmem [shape: f32[2,16,4], index: 0, kind: input, shape index: {}]   ;;  %s547_s1 = inlined_call_operand.vmem [shape: f32[4,16], index: 1, kind: input, shape index: {}]   ;;  %s548_s2 = inlined_call_operand.vmem [shape: f32[4,1], index: 2, kind: input, shape index: {}]   ;;  %s549_s3 = inlined_call_operand.vmem [shape: f32[4,1], index: 3, kind: input, shape index: {}]   ;;  %s550_s4 = inlined_call_operand.vmem [shape: f32[2,4,4], index: 4, kind: output, shape index: {}]  }
   0x1   :  { %s508_s17 = smov 0  }
   0x2 LB: > { %s26_s18 = sadd.s32 1, %s469_s16  ;;  %p401_p0 = scmp.ge.s32.totalorder %s473_s17, 1  ;;  %s473_s17 = sphi %s508_s17, %s14_s17   ;;  %s469_s16 = sphi %s506_s16, %s552_s16   ;;  %s465_s15 = sphi %s504_s15, %s551_s15  }
   0x3   : > { %p28_p1 = scmp.ge.s32.totalorder %s26_s18, 2  ;;  %p181_p2 = scmp.lt.s32.totalorder %s473_s17, 3 }
   0x5   : > { %s554_s18 = smov (%p28_p1, %s26_s18), 0  ;;  %p182_p3 = pnand %p401_p0, %p181_p2 }
   0x6   : > { %p212_p4 = scmp.lt.s32.totalorder (!%p182_p3), %s465_s15, 1  ;;  %v475_v0 = vmov (!%p182_p3), 0.0|0.0   ;;  %vm476_vm0 = vmmov (!%p182_p3), 0   ;;  %v477_v1 = vmov (!%p182_p3), 0.0   ;;  %v304_v2 = vld [vmem:[%s548_s2] sm:$0xf] (!%p182_p3) }
   0x7   : > { %185 = sbr.rel (%p182_p3) target bundleno = 240 (0xf0), region = 36  ;;  %419 = vmatprep.subr.bf16.mxu0 (!%p182_p3), %v475_v0  ;;  %416 = vmatprep.mubr.msk.f32.mxu0 (!%p182_p3), %vm476_vm0, %v477_v1  ;;  %v478_v3 = vmov (!%p182_p3), 0   ;;  %v311_v4 = vld [vmem:[%s549_s3] sm:$0xf] (!%p182_p3)  ;;  %vm230_vm1 = vcmask (!%p182_p3), 130048   ;;  %vm318_vm2 = vcmask (!%p182_p3), 27648  }
   0x8   : > { %450 = vset.pattern.permute.xlu0 (!%p182_p3), %v478_v3  ;;  %v227_v8 = vld [vmem:[%s547_s1] sm:$0xf] (!%p182_p3) }
   0x9   : > { %307 = vperm.xlu0 (!%p182_p3), %450, %v304_v2  }
   0xd   : > { %314 = vperm.xlu0 (!%p182_p3), %450, %v311_v4  }
   0xe   : > { %s556_s15 = smov (!%p212_p4, %s465_s15), 1 }
   0xf   : > { %s408_s21 = sshll.u32 %s556_s15, 4  ;;  %s404_s29 = sshll.u32 %s556_s15, 2 }
  0x10   : > { %s219_s26 = scalar_lea.vmem %s546_s0, %s408_s21  ;;  %s226_s6 = scalar_lea.vmem %s550_s4, %s404_s29 }
  0x11   : > { %v228_v5 = vld [vmem:[%s219_s26] sm:$0xff]  ;;  %v229_v6 = vld [vmem:[%s219_s26 + $0x8] sm:$0xff] }
  0x12   : > { %v420_v7 = vpack.c.bf16 %v229_v6, %v228_v5 }
  0x14   : > { %421 = vmatpush3.bf16.msra.mxu0 %v420_v7 }
  0x17   : > { %417 = vmatmul.mubr.msk.f32.vlgmr.msra.gmra.mrb[0].mxu0 %vm230_vm1, %v227_v8 }
  0x88   : > { %v308_v9 = vpop.permute.xlu0 %307 }
  0x8c   : > { %v315_v13 = vpop.permute.xlu0 %314 }
  0xea   : > { %v300_v10 = vpop.f32.mrb[0].mxu0 }
  0xeb   : > { %v310_v11 = vmul.f32 %v308_v9, %v300_v10  ;;  %v418_v12 = vpop.f32.mrb[1].mxu0 }
  0xed   : > { %v317_v14 = vadd.f32 %v315_v13, %v310_v11 }
  0xef   : > { %319 = vst.msk [vmem:[%s226_s6] sm:$0xf] %vm318_vm2, %v317_v14 }
  0xf0 PF: > { %s14_s17 = sadd.s32 1, %s473_s17   ;;  %s551_s15 = smov %s469_s16 }
  0xf1   : > { %p11_p5 = scmp.ge.s32.totalorder %s14_s17, 4   ;;  %s552_s16 = smov %s554_s18 }
  0xf3   :  { %13 = sbr.rel (!%p11_p5) target bundleno = 2 (0x2), region = 66 }

// kernel: dappm_forward.19
= control target key start
LH: loop header
LB: loop body
LE: loop exit
PB: predicated region body
PF: predicated region fallthrough
CT: control target
= control target key end

     0   :  { %s346_s9 = smov 0   ;;  %s366_s0 = inlined_call_operand.vmem [shape: f32[2,16,256], index: 0, kind: input, shape index: {}]   ;;  %s367_s1 = inlined_call_operand.vmem [shape: f32[4,16], index: 1, kind: input, shape index: {}]   ;;  %s368_s2 = inlined_call_operand.vmem [shape: f32[2,4,1], index: 2, kind: output, shape index: {}]  }
   0x1 LB: > { %s284_s10 = sadd.s32 4294967295, %s326_s9   ;;  %p288_p0 = scmp.ge.s32.totalorder %s326_s9, 1  ;;  %s326_s9 = sphi %s346_s9, %s12_s9  }
   0x2   : > { %p112_p1 = scmp.lt.s32.totalorder %s326_s9, 3 }
   0x4   : > { %p113_p2 = pnand %p288_p0, %p112_p1 }
   0x5   : > { %p133_p3 = scmp.lt.s32.totalorder (!%p113_p2), %s284_s10, 1  ;;  %v328_v6 = vmov (!%p113_p2), 0.0|0.0   ;;  %vm329_vm0 = vmmov (!%p113_p2), 0   ;;  %v330_v7 = vmov (!%p113_p2), 0.0   ;;  %v154_v13 = vld [vmem:[%s367_s1] sm:$0xf] (!%p113_p2) }
   0x6   : > { %116 = sbr.rel (%p113_p2) target bundleno = 385 (0x181), region = 28  ;;  %306 = vmatprep.subr.bf16.mxu0 (!%p113_p2), %v328_v6  ;;  %303 = vmatprep.mubr.msk.f32.mxu0 (!%p113_p2), %vm329_vm0, %v330_v7  ;;  %vm155_vm1 = vcmask (!%p113_p2), 130048   ;;  %vm229_vm2 = vcmask (!%p113_p2), 3072  }
   0xd   : > { %s370_s10 = smov (!%p133_p3, %s284_s10), 1 }
   0xe   : > { %s295_s11 = sshll.u32 %s370_s10, 5  ;;  %s291_s17 = sshll.u32 %s370_s10, 2 }
   0xf   : > { %s137_s14 = scalar_lea.vmem %s366_s0, %s295_s11  ;;  %s141_s20 = scalar_lea.vmem %s368_s2, %s291_s17 }
  0x10   : > { %v142_v0 = vld [vmem:[%s137_s14] sm:$0xff]  ;;  %v143_v1 = vld [vmem:[%s137_s14 + $0x8] sm:$0xff]  ;;  %v144_v2 = vld [vmem:[%s137_s14 + $0x10] sm:$0xff] }
  0x11   : > { %v146_v3 = vadd.f32 %v143_v1, %v142_v0  ;;  %v145_v4 = vld [vmem:[%s137_s14 + $0x18] sm:$0xff] }
  0x12   : > { %v149_v5 = vadd.f32 %v145_v4, %v144_v2 }
  0x13   : > { %147 = vadd.xlane.f32.xlu0 %v146_v3 }
  0x17   : > { %150 = vadd.xlane.f32.xlu0 %v149_v5 }
  0xa0   : > { %v148_v8 = vpop.xlane.xlu0 %147 }
  0xa1   : > { %v152_v10 = vmul.f32 0.00390625, %v148_v8 }
  0xa4   : > { %v151_v9 = vpop.xlane.xlu0 %150 }
  0xa5   : > { %v153_v11 = vmul.f32 0.00390625, %v151_v9 }
  0xa7   : > { %v307_v12 = vpack.c.bf16 %v153_v11, %v152_v10 }
  0xa9   : > { %308 = vmatpush3.bf16.msra.mxu0 %v307_v12 }
  0xac   : > { %304 = vmatmul.mubr.msk.f32.vlgmr.msra.gmra.mrb[0].mxu0 %vm155_vm1, %v154_v13 }
 0x17f   : > { %v225_v14 = vpop.f32.mrb[0].mxu0 }
 0x180   : > { %230 = vst.msk [vmem:[%s141_s20] sm:$0xf] %vm229_vm2, %v225_v14  ;;  %v305_v15 = vpop.f32.mrb[1].mxu0 }
 0x181 PF: > { %s12_s9 = sadd.s32 1, %s326_s9  }
 0x182   : > { %p9_p4 = scmp.ge.s32.totalorder %s12_s9, 4  }
 0x184   :  { %11 = sbr.rel (!%p9_p4) target bundleno = 1 (0x1), region = 58 }

// kernel: dappm_forward.11
= control target key start
LH: loop header
LB: loop body
LE: loop exit
PB: predicated region body
PF: predicated region fallthrough
CT: control target
= control target key end

     0   :  { %s554_s15 = smov 0   ;;  %s556_s16 = smov 0   ;;  %s612_s0 = inlined_call_operand.vmem [shape: f32[2,16,256], index: 0, kind: input, shape index: {}]   ;;  %s613_s1 = inlined_call_operand.vmem [shape: f32[16,16], index: 1, kind: input, shape index: {}]   ;;  %s614_s2 = inlined_call_operand.vmem [shape: f32[16,1], index: 2, kind: input, shape index: {}]   ;;  %s615_s3 = inlined_call_operand.vmem [shape: f32[16,1], index: 3, kind: input, shape index: {}]   ;;  %s616_s4 = inlined_call_operand.vmem [shape: f32[2,16,256], index: 4, kind: output, shape index: {}]  }
   0x1   :  { %s558_s17 = smov 0  }
   0x2 LB: > { %s26_s18 = sadd.s32 1, %s521_s16  ;;  %p458_p0 = scmp.ge.s32.totalorder %s525_s17, 1  ;;  %s525_s17 = sphi %s558_s17, %s14_s17   ;;  %s521_s16 = sphi %s556_s16, %s618_s16   ;;  %s517_s15 = sphi %s554_s15, %s617_s15  }
   0x3   : > { %p28_p1 = scmp.ge.s32.totalorder %s26_s18, 2  ;;  %p183_p2 = scmp.lt.s32.totalorder %s525_s17, 3 }
   0x5   : > { %s620_s18 = smov (%p28_p1, %s26_s18), 0  ;;  %p184_p3 = pnand %p458_p0, %p183_p2 }
   0x6   : > { %p218_p4 = scmp.lt.s32.totalorder (!%p184_p3), %s517_s15, 1  ;;  %v527_v0 = vmov (!%p184_p3), 0.0   ;;  %v327_v1 = vld [vmem:[%s614_s2] sm:$0xff] (!%p184_p3)  ;;  %v528_v3 = vmov (!%p184_p3), 0   ;;  %v328_v4 = vld [vmem:[%s614_s2 + $0x8] sm:$0xff] (!%p184_p3)  ;;  %vm243_vm0 = vcmask (!%p184_p3), 130048  }
   0x7   : > { %187 = sbr.rel (%p184_p3) target bundleno = 244 (0xf4), region = 36  ;;  %314 = vmatprep.mubr.f32.mxu0 (!%p184_p3), %v527_v0  ;;  %320 = vmatprep.mubr.f32.mxu1 (!%p184_p3), %v527_v0  ;;  %v343_v2 = vld [vmem:[%s615_s3] sm:$0xff] (!%p184_p3)  ;;  %v344_v5 = vld [vmem:[%s615_s3 + $0x8] sm:$0xff] (!%p184_p3) }
   0x8   : > { %501 = vset.pattern.permute.xlu0 (!%p184_p3), %v528_v3  ;;  %502 = vset.pattern.permute.xlu1 (!%p184_p3), %v528_v3  ;;  %v237_v12 = vld [vmem:[%s613_s1] sm:$0xff] (!%p184_p3)  ;;  %v238_v13 = vld [vmem:[%s613_s1 + $0x8] sm:$0xff] (!%p184_p3) }
   0x9   : > { %331 = vperm.xlu0 (!%p184_p3), %501, %v327_v1   ;;  %347 = vperm.xlu1 (!%p184_p3), %502, %v343_v2  }
   0xd   : > { %336 = vperm.xlu0 (!%p184_p3), %501, %v328_v4   ;;  %352 = vperm.xlu1 (!%p184_p3), %502, %v344_v5  }
   0xe   : > { %s622_s15 = smov (!%p218_p4, %s517_s15), 1 }
   0xf   : > { %s467_s23 = sshll.u32 %s622_s15, 5 }
  0x10   : > { %s225_s30 = scalar_lea.vmem %s612_s0, %s467_s23  ;;  %s235_s11 = scalar_lea.vmem %s616_s4, %s467_s23 }
  0x11   : > { %v240_v6 = vld [vmem:[%s225_s30 + $0x8] sm:$0xff]  ;;  %v242_v7 = vld [vmem:[%s225_s30 + $0x18] sm:$0xff]  ;;  %v239_v8 = vld [vmem:[%s225_s30] sm:$0xff] }
  0x12   : > { %v469_v9 = vpack.c.bf16 %v242_v7, %v240_v6  ;;  %v241_v10 = vld [vmem:[%s225_s30 + $0x10] sm:$0xff] }
  0x13   : > { %v471_v11 = vpack.c.bf16 %v241_v10, %v239_v8 }
  0x14   : > { %470 = vmatprep.subr.bf16.mxu0 %v469_v9  ;;  %473 = vmatprep.subr.bf16.mxu1 %v469_v9 }
  0x15   : > { %472 = vmatpush1.bf16.msra.mxu0 %v471_v11  ;;  %474 = vmatpush1.bf16.msra.mxu1 %v471_v11 }
  0x18   : > { %463 = vmatmul.mubr.msk.f32.vlgmr.msra.gmra.mrb[0].mxu0 %vm243_vm0, %v237_v12  ;;  %464 = vmatmul.mubr.msk.f32.vlgmr.msra.gmra.mrb[0].mxu1 %vm243_vm0, %v238_v13 }
  0x88   : > { %v332_v14 = vpop.permute.xlu0 %331  ;;  %v348_v15 = vpop.permute.xlu1 %347 }
  0x8c   : > { %v337_v16 = vpop.permute.xlu0 %336  ;;  %v353_v23 = vpop.permute.xlu1 %352 }
  0xeb   : > { %v316_v17 = vpop.f32.mrb[0].mxu0  ;;  %v322_v18 = vpop.f32.mrb[0].mxu1 }
  0xec   : > { %v339_v19 = vmul.f32 %v332_v14, %v316_v17  ;;  %v341_v20 = vmul.f32 %v337_v16, %v322_v18  ;;  %v318_v21 = vpop.f32.mrb[1].mxu0  ;;  %v324_v22 = vpop.f32.mrb[1].mxu1 }
  0xed   : > { %v340_v24 = vmul.f32 %v332_v14, %v318_v21  ;;  %v342_v25 = vmul.f32 %v337_v16, %v324_v22 }
  0xee   : > { %v355_v26 = vadd.f32 %v348_v15, %v339_v19  ;;  %v357_v27 = vadd.f32 %v353_v23, %v341_v20 }
  0xef   : > { %v356_v28 = vadd.f32 %v348_v15, %v340_v24  ;;  %v358_v29 = vadd.f32 %v353_v23, %v342_v25 }
  0xf0   : > { %v359_v30 = vmax.f32 %v355_v26, 0.0  ;;  %v361_v31 = vmax.f32 %v357_v27, 0.0 }
  0xf1   : > { %v360_v32 = vmax.f32 %v356_v28, 0.0  ;;  %v362_v33 = vmax.f32 %v358_v29, 0.0 }
  0xf2   : > { %363 = vst [vmem:[%s235_s11] sm:$0xff] %v359_v30  ;;  %365 = vst [vmem:[%s235_s11 + $0x10] sm:$0xff] %v361_v31 }
  0xf3   : > { %364 = vst [vmem:[%s235_s11 + $0x8] sm:$0xff] %v360_v32  ;;  %366 = vst [vmem:[%s235_s11 + $0x18] sm:$0xff] %v362_v33 }
  0xf4 PF: > { %s14_s17 = sadd.s32 1, %s525_s17   ;;  %s617_s15 = smov %s521_s16 }
  0xf5   : > { %p11_p5 = scmp.ge.s32.totalorder %s14_s17, 4   ;;  %s618_s16 = smov %s620_s18 }
  0xf7   :  { %13 = sbr.rel (!%p11_p5) target bundleno = 2 (0x2), region = 66 }

// kernel: dappm_forward.20
= control target key start
LH: loop header
LB: loop body
LE: loop exit
PB: predicated region body
PF: predicated region fallthrough
CT: control target
= control target key end

     0   :  { %s773_s18 = smov 0   ;;  %s879_s0 = inlined_call_operand.vmem [shape: f32[2,4,256], index: 0, kind: input, shape index: {}]   ;;  %s880_s1 = inlined_call_operand.vmem [shape: f32[2,4,1], index: 1, kind: input, shape index: {}]   ;;  %s881_s2 = inlined_call_operand.vmem [shape: f32[4,36], index: 2, kind: input, shape index: {}]   ;;  %s882_s3 = inlined_call_operand.vmem [shape: f32[4,1], index: 3, kind: input, shape index: {}]   ;;  %s883_s4 = inlined_call_operand.vmem [shape: f32[4,1], index: 4, kind: input, shape index: {}]   ;;  %s884_s5 = inlined_call_operand.vmem [shape: f32[2,4,256], index: 5, kind: output, shape index: {}]  }
   0x1 LB: > { %s672_s19 = sadd.s32 4294967295, %s729_s18   ;;  %p676_p0 = scmp.ge.s32.totalorder %s729_s18, 1  ;;  %s729_s18 = sphi %s773_s18, %s15_s18  }
   0x2   : > { %p196_p1 = scmp.lt.s32.totalorder %s729_s18, 3 }
   0x4   : > { %p197_p2 = pnand %p676_p0, %p196_p1 }
   0x5   : > { %p228_p3 = scmp.lt.s32.totalorder (!%p197_p2), %s672_s19, 1  ;;  %v731_v0 = vmov (!%p197_p2), 0   ;;  %vm243_vm0 = vcmask (!%p197_p2), 273408   ;;  %v732_v2 = vmov (!%p197_p2), 0.0   ;;  %v733_v3 = vmov (!%p197_p2), 839922192  }
   0x6   : > { %200 = sbr.rel (%p197_p2) target bundleno = 670 (0x29e), region = 40  ;;  %717 = vset.pattern.permute.xlu0 (!%p197_p2), %v731_v0  ;;  %718 = vset.pattern.permute.xlu1 (!%p197_p2), %v731_v0  ;;  %242 = vst [vmem:[#allocation2] sm:$0xff] (!%p197_p2), %v732_v2  ;;  %244 = vst.msk [vmem:[#allocation2 + $0x8] sm:$0xf] (!%p197_p2), %vm243_vm0, %v732_v2  ;;  %v252_v4 = vunpack.c.l.s4 (!%p197_p2), %v733_v3  ;;  %v254_v5 = vlaneseq (!%p197_p2)  ;;  %s734_s28 = smov (!%p197_p2), 17   ;;  %vm268_vm1 = vcmask (!%p197_p2), 1043592  }
   0x7   : > { %575 = vmatprep.mubr.f32.mxu0 (!%p197_p2), %v732_v2  ;;  %vm269_vm2 = vcmask (!%p197_p2), 1047556   ;;  %vm264_vm3 = vcmask (!%p197_p2), 138240   ;;  %vm272_vm4 = vcmask (!%p197_p2), 134144   ;;  %s735_s29 = smov (!%p197_p2), 112   ;;  %s736_s30 = smov (!%p197_p2), 126   ;;  %vm329_vm8 = vcmask (!%p197_p2), 1039360  }
   0x8   : > { %v253_v6 = vunpack.c.0.s8 (!%p197_p2), %v252_v4  ;;  %v255_v7 = vshrl.u32 (!%p197_p2), %v254_v5, 7  ;;  %v793_v13 = vand.u32 (!%p197_p2), 127, %v254_v5  ;;  %vm270_vm5 = vmor (!%p197_p2), %vm269_vm2, %vm268_vm1  ;;  %s737_s6 = smov (!%p197_p2), 96   ;;  %s738_s7 = smov (!%p197_p2), 110   ;;  %v582_v35 = vld [vmem:[%s882_s3] sm:$0xf] (!%p197_p2) }
   0x9   : > { %s739_s8 = smov (!%p197_p2), 111   ;;  %s740_s9 = smov (!%p197_p2), 127   ;;  %v590_v36 = vld [vmem:[%s883_s4] sm:$0xf] (!%p197_p2)  ;;  %vm462_vm9 = vcmask (!%p197_p2), 777216   ;;  %vm371_vm10 = vcmask (!%p197_p2), 916480  }
   0xa   : > { %v256_v8 = vsub.s32 (!%p197_p2), %v253_v6, %v255_v7  ;;  %v796_v17 = vadd.s32 (!%p197_p2), 128, %v793_v13  ;;  %v281_v18 = vand.u32 (!%p197_p2), 15, %v793_v13  ;;  %s741_s10 = smov (!%p197_p2), 95   ;;  %s742_s11 = smov (!%p197_p2), 94   ;;  %vm441_vm11 = vcmask (!%p197_p2), 785408  }
   0xb   : > { %vm351_vm12 = vcmask (!%p197_p2), 1031168   ;;  %vm397_vm13 = vcmask (!%p197_p2), 908288   ;;  %vm415_vm0 = vcmask (!%p197_p2), 900096   ;;  %vm480_vm1 = vcmask (!%p197_p2), 769024  }
   0xc   : > { %v288_v19 = vand.u32 (!%p197_p2), 15, %v796_v17  ;;  %vm802_vm6 = vcmp.ge.s32.totalorder (!%p197_p2), %v281_v18, 1  ;;  %vm839_vm14 = vcmp.le.s32.totalorder (!%p197_p2), %v281_v18, 14  ;;  %vm504_vm2 = vcmask (!%p197_p2), 1043456  }
   0xd   : > { %s894_s19 = smov (!%p228_p3, %s672_s19), 1 }
   0xe   : > { %s679_s20 = sshll.u32 %s894_s19, 2  ;;  %s687_s24 = sshll.u32 %s894_s19, 3  ;;  %vm810_vm7 = vcmp.ge.s32.totalorder %v288_v19, 1  ;;  %vm845_vm15 = vcmp.le.s32.totalorder %v288_v19, 14 }
   0xf   : > { %s236_s23 = scalar_lea.vmem %s880_s1, %s679_s20  ;;  %s232_s27 = scalar_lea.vmem %s879_s0, %s687_s24 }
  0x10   : > { %v246_v1 = vld [vmem:[%s236_s23] sm:$0xf]  ;;  %s241_s22 = scalar_lea.vmem %s884_s5, %s687_s24 }
  0x11   : > { %249 = vperm.xlu0 %717, %v246_v1   ;;  %v245_v10 = vld [vmem:[%s232_s27] sm:$0xff] }
  0x90   : > { %v250_v9 = vpop.permute.xlu0 %249 }
  0x91   : > { %v257_v11 = vrot.slane %v250_v9, %v256_v8 }
  0x93   : > { %v259_v12 = vadd.f32 %v257_v11, %v245_v10 }
  0x95   : > { %261 = vrot.lane.b32.xlu0 %v259_v12, %s734_s28 }
 0x107   : > { %v262_v14 = vpop.permute.xlu0 %261 }
 0x108   : > { %v263_v15 = vrot.slane %v262_v14, 4 }
 0x10a   : > { %v265_v16 = vsel %vm264_vm3, %v263_v15, %v262_v14  ;;  %273 = vst.msk [vmem:[#allocation2 + $0x8] sm:$0xf] %vm272_vm4, %v263_v15  ;;  %vm500_vm3 = vcmask 293888  }
 0x10b   : > { %271 = vst.msk [vmem:[#allocation2] sm:$0xff] %vm270_vm5, %v265_v16 }
 0x111   : > { %v361_v20 = vld [vmem:[#allocation2 + $0x8] sm:$0xf] }
 0x112   : > { %v337_v21 = vld [vmem:[#allocation2 + $0x8] sm:$0xf]  ;;  %369 = vrot.lane.b32.xlu1 %v361_v20, %s735_s29  ;;  %v360_v23 = vld [vmem:[#allocation2] sm:$0xff] }
 0x113   : > { %349 = vrot.lane.b32.xlu0 %v337_v21, %s736_s30  ;;  %v364_v25 = vcombine.high %v360_v23, %v360_v23  ;;  %v313_v26 = vsel %vm802_vm6, %v360_v23, 0.0  ;;  %v431_v27 = vld [vmem:[#allocation2 + $0x8] sm:$0xf]  ;;  %v321_v33 = vcombine.low %v360_v23, %v360_v23 }
 0x114   : > { %v405_v28 = vld [vmem:[#allocation2 + $0x8] sm:$0xf]  ;;  %315 = vst [vmem:[#allocation3] sm:$0xf] %v313_v26 }
 0x115   : > { %v314_v29 = vsel %vm810_vm7, %v364_v25, 0.0  ;;  %v387_v30 = vld [vmem:[#allocation2 + $0x8] sm:$0xf] }
 0x116   : > { %439 = vrot.lane.b32.xlu1 %v431_v27, %s737_s6  ;;  %316 = vst [vmem:[#allocation3 + $0x8] sm:$0xf] %v314_v29  ;;  %v721_v31 = vld [vmem:[#allocation2 + $0x8] ss:$0 sps:$4 sm:$0xff]  }
 0x117   : > { %413 = vrot.lane.b32.xlu0 %v405_v28, %s738_s7  ;;  %v722_v32 = vld [vmem:[#allocation2 + $0x8] ss:$0 sps:$4 sm:$0xff]  }
 0x118   : > { %v470_v34 = vld [vmem:[#allocation2 + $0x8] sm:$0xf] }
 0x11a   : > { %395 = vrot.lane.b32.xlu1 %v387_v30, %s739_s8 }
 0x11b   : > { %365 = vrot.lane.b32.xlu0 %v360_v23, %s735_s29 }
 0x11e   : > { %325 = vrot.lane.b32.xlu1 %v360_v23, %s740_s9 }
 0x11f   : > { %435 = vrot.lane.b32.xlu0 %v360_v23, %s737_s6 }
 0x122   : > { %345 = vrot.lane.b32.xlu1 %v360_v23, %s736_s30 }
 0x123   : > { %327 = vrot.lane.b32.xlu0 %v721_v31, %s740_s9 }
 0x126   : > { %409 = vrot.lane.b32.xlu1 %v360_v23, %s738_s7 }
 0x127   : > { %460 = vrot.lane.b32.xlu0 %v722_v32, %s741_s10 }
 0x12a   : > { %458 = vrot.lane.b32.xlu1 %v360_v23, %s741_s10 }
 0x12b   : > { %323 = vrot.lane.b32.xlu0 %v321_v33, %s740_s9 }
 0x12e   : > { %367 = vrot.lane.b32.xlu1 %v364_v25, %s735_s29 }
 0x12f   : > { %437 = vrot.lane.b32.xlu0 %v364_v25, %s737_s6 }
 0x132   : > { %347 = vrot.lane.b32.xlu1 %v364_v25, %s736_s30 }
 0x133   : > { %393 = vrot.lane.b32.xlu0 %v364_v25, %s739_s8 }
 0x136   : > { %411 = vrot.lane.b32.xlu1 %v364_v25, %s738_s7 }
 0x137   : > { %456 = vrot.lane.b32.xlu0 %v321_v33, %s741_s10 }
 0x13a   : > { %391 = vrot.lane.b32.xlu1 %v360_v23, %s739_s8 }
 0x13b   : > { %478 = vrot.lane.b32.xlu0 %v470_v34, %s742_s11 }
 0x13e   : > { %476 = vrot.lane.b32.xlu1 %v364_v25, %s742_s11 }
 0x13f   : > { %585 = vperm.xlu0 %717, %v582_v35  }
 0x142   : > { %474 = vrot.lane.b32.xlu1 %v360_v23, %s742_s11 }
 0x146   : > { %593 = vperm.xlu1 %718, %v590_v36  }
 0x184   : > { %v370_v37 = vpop.permute.xlu1 %369 }
 0x185   : > { %v350_v38 = vpop.permute.xlu0 %349 }
 0x188   : > { %v440_v39 = vpop.permute.xlu1 %439 }
 0x189   : > { %v414_v40 = vpop.permute.xlu0 %413 }
 0x18c   : > { %v396_v41 = vpop.permute.xlu1 %395 }
 0x18d   : > { %v366_v42 = vpop.permute.xlu0 %365 }
 0x190   : > { %v326_v44 = vpop.permute.xlu1 %325 }
 0x191   : > { %v436_v43 = vpop.permute.xlu0 %435 }
 0x194   : > { %v346_v46 = vpop.permute.xlu1 %345 }
 0x195   : > { %v328_v45 = vpop.permute.xlu0 %327 }
 0x196   : > { %v331_v47 = vsel %vm329_vm8, %v326_v44, %v328_v45 }
 0x197   : > { %335 = vst [vmem:[#allocation3 + $0x8] sm:$0xf0] %v331_v47 }
 0x198   : > { %v410_v49 = vpop.permute.xlu1 %409 }
 0x199   : > { %v461_v48 = vpop.permute.xlu0 %460 }
 0x19c   : > { %v459_v50 = vpop.permute.xlu1 %458 }
 0x19d   : > { %v324_v51 = vpop.permute.xlu0 %323  ;;  %v464_v52 = vsel %vm462_vm9, %v459_v50, %v461_v48 }
 0x19e   : > { %v330_v53 = vsel %vm329_vm8, %v324_v51, %v326_v44  ;;  %468 = vst [vmem:[#allocation3 + $0x38] sm:$0xf0] %v464_v52  ;;  %v491_v22 = vld [vmem:[#allocation3 + $0x8] sm:$0xff] }
 0x19f   : > { %334 = vst [vmem:[#allocation3] sm:$0xf0] %v330_v53 }
 0x1a0   : > { %v368_v54 = vpop.permute.xlu1 %367 }
 0x1a1   : > { %v438_v55 = vpop.permute.xlu0 %437  ;;  %v372_v56 = vsel %vm371_vm10, %v366_v42, %v368_v54  ;;  %v373_v57 = vsel %vm371_vm10, %v368_v54, %v370_v37  ;;  %v489_v42 = vld [vmem:[%s881_s2] sm:$0xf] }
 0x1a2   : > { %v442_v58 = vsel %vm441_vm11, %v436_v43, %v438_v55  ;;  %v443_v59 = vsel %vm441_vm11, %v438_v55, %v440_v39  ;;  %v376_v60 = vsel %vm802_vm6, %v372_v56, 0.0  ;;  %v377_v61 = vsel %vm810_vm7, %v373_v57, 0.0 }
 0x1a3   : > { %v446_v62 = vsel %vm802_vm6, %v442_v58, 0.0  ;;  %v447_v63 = vsel %vm810_vm7, %v443_v59, 0.0  ;;  %v380_v0 = vrot.slane %v376_v60, 4  ;;  %v381_v1 = vrot.slane %v377_v61, 4 }
 0x1a4   : > { %448 = vst [vmem:[#allocation3 + $0x30] sm:$0xf] %v446_v62  ;;  %449 = vst [vmem:[#allocation3 + $0x38] sm:$0xf] %v447_v63  ;;  %v348_v4 = vpop.permute.xlu1 %347 }
 0x1a5   : > { %v394_v5 = vpop.permute.xlu0 %393  ;;  %384 = vst [vmem:[#allocation3 + $0x10] sm:$0xf0] %v380_v0  ;;  %385 = vst [vmem:[#allocation3 + $0x18] sm:$0xf0] %v381_v1  ;;  %v352_v6 = vsel %vm351_vm12, %v346_v46, %v348_v4  ;;  %v353_v7 = vsel %vm351_vm12, %v348_v4, %v350_v38 }
 0x1a6   : > { %v399_v8 = vsel %vm397_vm13, %v394_v5, %v396_v41  ;;  %v356_v9 = vsel %vm839_vm14, %v352_v6, 0.0  ;;  %v357_v10 = vsel %vm845_vm15, %v353_v7, 0.0  ;;  %v490_v24 = vld [vmem:[#allocation3] sm:$0xff] }
 0x1a7   : > { %403 = vst [vmem:[#allocation3 + $0x28] sm:$0xf] %v399_v8  ;;  %358 = vst [vmem:[#allocation3 + $0x10] sm:$0xf] %v356_v9 }
 0x1a8   : > { %359 = vst [vmem:[#allocation3 + $0x18] sm:$0xf] %v357_v10  ;;  %v412_v11 = vpop.permute.xlu1 %411 }
 0x1a9   : > { %v457_v12 = vpop.permute.xlu0 %456  ;;  %v416_v13 = vsel %vm415_vm0, %v410_v49, %v412_v11  ;;  %v417_v14 = vsel %vm415_vm0, %v412_v11, %v414_v40 }
 0x1aa   : > { %v463_v15 = vsel %vm462_vm9, %v457_v12, %v459_v50  ;;  %v420_v16 = vsel %vm839_vm14, %v416_v13, 0.0  ;;  %v421_v17 = vsel %vm845_vm15, %v417_v14, 0.0 }
 0x1ab   : > { %467 = vst [vmem:[#allocation3 + $0x30] sm:$0xf0] %v463_v15  ;;  %v424_v18 = vrot.slane %v420_v16, 4  ;;  %v425_v19 = vrot.slane %v421_v17, 4  ;;  %v497_v34 = vld [vmem:[#allocation3 + $0x38] sm:$0xff] }
 0x1ac   : > { %v392_v20 = vpop.permute.xlu1 %391 }
 0x1ad   : > { %428 = vst [vmem:[#allocation3 + $0x20] sm:$0xf0] %v424_v18  ;;  %429 = vst [vmem:[#allocation3 + $0x28] sm:$0xf0] %v425_v19  ;;  %v398_v21 = vsel %vm397_vm13, %v392_v20, %v394_v5  ;;  %v479_v28 = vpop.permute.xlu0 %478 }
 0x1ae   : > { %402 = vst [vmem:[#allocation3 + $0x20] sm:$0xf] %v398_v21  ;;  %v492_v25 = vld [vmem:[#allocation3 + $0x10] sm:$0xff] }
 0x1af   : > { %v493_v23 = vld [vmem:[#allocation3 + $0x18] sm:$0xff]  ;;  %v691_v27 = vpack.c.bf16 %v492_v25, %v490_v24 }
 0x1b0   : > { %v689_v26 = vpack.c.bf16 %v493_v23, %v491_v22  ;;  %v477_v29 = vpop.permute.xlu1 %476 }
 0x1b1   : > { %v482_v30 = vsel %vm480_vm1, %v477_v29, %v479_v28 }
 0x1b2   : > { %690 = vmatprep.subr.bf16.mxu0 %v689_v26  ;;  %v486_v31 = vsel %vm845_vm15, %v482_v30, 0.0  ;;  %v496_v38 = vld [vmem:[#allocation3 + $0x30] sm:$0xff] }
 0x1b3   : > { %692 = vmatpush1.bf16.msra.mxu0 %v691_v27  ;;  %488 = vst [vmem:[#allocation3 + $0x48] sm:$0xf] %v486_v31 }
 0x1b4   : > { %v475_v32 = vpop.permute.xlu1 %474  ;;  %v495_v33 = vld [vmem:[#allocation3 + $0x28] sm:$0xff] }
 0x1b5   : > { %v481_v35 = vsel %vm480_vm1, %v475_v32, %v477_v29  ;;  %v693_v36 = vpack.c.bf16 %v497_v34, %v495_v33  ;;  %v494_v37 = vld [vmem:[#allocation3 + $0x20] sm:$0xff] }
 0x1b6   : > { %v485_v39 = vsel %vm839_vm14, %v481_v35, 0.0  ;;  %v695_v40 = vpack.c.bf16 %v496_v38, %v494_v37 }
 0x1b7   : > { %487 = vst [vmem:[#allocation3 + $0x40] sm:$0xf] %v485_v39  ;;  %694 = vmatprep.subr.bf16.mxu0 %v693_v36 }
 0x1b8   : > { %696 = vmatpush1.bf16.msra.mxu0 %v695_v40 }
 0x1ba   : > { %v499_v41 = vld [vmem:[#allocation3 + $0x48] sm:$0xf] }
 0x1bb   : > { %682 = vmatprep.subr.msk.mxu0 %vm504_vm2, %v499_v41 }
 0x1be   : > { %v498_v43 = vld [vmem:[#allocation3 + $0x40] sm:$0xf]  ;;  %v586_v44 = vpop.permute.xlu0 %585 }
 0x1bf   : > { %683 = vmatpush1.msk.msra.mxu0 %vm504_vm2, %v498_v43 }
 0x1c0   : > { %684 = vmatmul.mubr.msk.f32.vlgmr.msra.gmra.mrb[0].mxu0 %vm500_vm3, %v489_v42 }
 0x1c5   : > { %v594_v46 = vpop.permute.xlu1 %593 }
 0x293   : > { %v577_v45 = vpop.f32.mrb[0].mxu0 }
 0x294   : > { %v588_v47 = vmul.f32 %v586_v44, %v577_v45  ;;  %v579_v48 = vpop.f32.mrb[1].mxu0 }
 0x295   : > { %v589_v49 = vmul.f32 %v586_v44, %v579_v48 }
 0x296   : > { %v596_v50 = vadd.f32 %v594_v46, %v588_v47 }
 0x297   : > { %v597_v51 = vadd.f32 %v594_v46, %v589_v49 }
 0x298   : > { %v598_v52 = vmax.f32 %v596_v50, 0.0 }
 0x299   : > { %v599_v53 = vmax.f32 %v597_v51, 0.0 }
 0x29b   : > { %v602_v54 = vcombine.low %v598_v52, %v599_v53 }
 0x29d   : > { %604 = vst [vmem:[%s241_s22] sm:$0xff] %v602_v54 }
 0x29e PF: > { %s15_s18 = sadd.s32 1, %s729_s18  }
 0x29f   : > { %p12_p4 = scmp.ge.s32.totalorder %s15_s18, 4  }
 0x2a1   :  { %14 = sbr.rel (!%p12_p4) target bundleno = 1 (0x1), region = 73 }

// kernel: dappm_forward.21
= control target key start
LH: loop header
LB: loop body
LE: loop exit
PB: predicated region body
PF: predicated region fallthrough
CT: control target
= control target key end

     0   :  { %s1438_s30 = smov 0   ;;  %s1440_s10 = smov 0   ;;  %s1564_s0 = inlined_call_operand.vmem [shape: f32[2,4,256], index: 0, kind: input, shape index: {}]   ;;  %s1565_s1 = inlined_call_operand.vmem [shape: f32[2,4,256], index: 1, kind: input, shape index: {}]   ;;  %s1566_s2 = inlined_call_operand.vmem [shape: f32[2,4,256], index: 2, kind: input, shape index: {}]   ;;  %s1567_s3 = inlined_call_operand.vmem [shape: f32[2,4,256], index: 3, kind: input, shape index: {}]   ;;  %s1568_s4 = inlined_call_operand.vmem [shape: f32[2,4,256], index: 4, kind: input, shape index: {}]   ;;  %s1569_s5 = inlined_call_operand.vmem [shape: f32[5,16,4], index: 5, kind: input, shape index: {}]   ;;  %s1570_s6 = inlined_call_operand.vmem [shape: f32[16,1], index: 6, kind: input, shape index: {}]   ;;  %s1571_s7 = inlined_call_operand.vmem [shape: f32[16,1], index: 7, kind: input, shape index: {}]   ;;  %s1572_s8 = inlined_call_operand.vmem [shape: f32[2,16,256], index: 8, kind: input, shape index: {}]   ;;  %s1573_s9 = inlined_call_operand.vmem [shape: f32[2,16,256], index: 9, kind: output, shape index: {}]  }
   0x1   :  { %s1442_s11 = smov 0  }
   0x2 LB: > { %s31_s12 = sadd.s32 1, %s1380_s10  ;;  %p1259_p0 = scmp.ge.s32.totalorder %s1384_s11, 1  ;;  %s1384_s11 = sphi %s1442_s11, %s19_s11   ;;  %s1380_s10 = sphi %s1440_s10, %s1575_s10   ;;  %s1376_s30 = sphi %s1438_s30, %s1574_s30  }
   0x3   : > { %p33_p1 = scmp.ge.s32.totalorder %s31_s12, 2  ;;  %p393_p2 = scmp.lt.s32.totalorder %s1384_s11, 3 }
   0x5   : > { %s1577_s12 = smov (%p33_p1, %s31_s12), 0  ;;  %p394_p3 = pnand %p1259_p0, %p393_p2 }
   0x6   : > { %p483_p4 = scmp.lt.s32.totalorder (!%p394_p3), %s1376_s30, 1  ;;  %v1386_v0 = vmov (!%p394_p3), 0.0   ;;  %v1387_v1 = vmov (!%p394_p3), 0   ;;  %v1030_v2 = vld [vmem:[%s1570_s6] sm:$0xff] (!%p394_p3)  ;;  %v1031_v4 = vld [vmem:[%s1570_s6 + $0x8] sm:$0xff] (!%p394_p3)  ;;  %vm568_vm0 = vcmask (!%p394_p3), 1043456  }
   0x7   : > { %397 = sbr.rel (%p394_p3) target bundleno = 267 (0x10b), region = 56  ;;  %637 = vmatprep.mubr.f32.mxu1 (!%p394_p3), %v1386_v0  ;;  %819 = vmatprep.mubr.f32.mxu0 (!%p394_p3), %v1386_v0  ;;  %v1046_v3 = vld [vmem:[%s1571_s7] sm:$0xff] (!%p394_p3)  ;;  %v1274_v11 = vld [vmem:[%s1569_s5 + $0x10] sm:$0xff] (!%p394_p3)  ;;  %vm561_vm1 = vcmask (!%p394_p3), 31744   ;;  %v1275_v16 = vld [vmem:[%s1569_s5 + $0x18] sm:$0xff] (!%p394_p3) }
   0x8   : > { %1355 = vset.pattern.permute.xlu0 (!%p394_p3), %v1387_v1  ;;  %1356 = vset.pattern.permute.xlu1 (!%p394_p3), %v1387_v1  ;;  %v1284_v14 = vld [vmem:[%s1569_s5 + $0x20] sm:$0xff] (!%p394_p3)  ;;  %v1047_v18 = vld [vmem:[%s1571_s7 + $0x8] sm:$0xff] (!%p394_p3)  ;;  %v1290_v20 = vld [vmem:[%s1569_s5 + $0x30] sm:$0xff] (!%p394_p3) }
   0x9   : > { %1034 = vperm.xlu0 (!%p394_p3), %1355, %v1030_v2   ;;  %1050 = vperm.xlu1 (!%p394_p3), %1356, %v1046_v3   ;;  %v552_v19 = vld [vmem:[%s1569_s5] sm:$0xff] (!%p394_p3)  ;;  %v553_v21 = vld [vmem:[%s1569_s5 + $0x8] sm:$0xff] (!%p394_p3)  ;;  %v1291_v22 = vld [vmem:[%s1569_s5 + $0x38] sm:$0xff] (!%p394_p3) }
   0xa   : > { %v1296_v23 = vld [vmem:[%s1569_s5 + $0x40] sm:$0xff] (!%p394_p3)  ;;  %v1285_v24 = vld [vmem:[%s1569_s5 + $0x28] sm:$0xff] (!%p394_p3) }
   0xb   : > { %v1297_v25 = vld [vmem:[%s1569_s5 + $0x48] sm:$0xff] (!%p394_p3) }
   0xd   : > { %1039 = vperm.xlu0 (!%p394_p3), %1355, %v1031_v4   ;;  %1055 = vperm.xlu1 (!%p394_p3), %1356, %v1047_v18  }
   0xe   : > { %s1579_s30 = smov (!%p483_p4, %s1376_s30), 1 }
   0xf   : > { %s1304_s15 = sshll.u32 %s1579_s30, 3 }
  0x10   : > { %s500_s20 = scalar_lea.vmem %s1565_s1, %s1304_s15  ;;  %s510_s23 = scalar_lea.vmem %s1566_s2, %s1304_s15 }
  0x11   : > { %v558_v5 = vld [vmem:[%s500_s20] sm:$0xff]  ;;  %s490_s28 = scalar_lea.vmem %s1564_s0, %s1304_s15  ;;  %s520_s14 = scalar_lea.vmem %s1567_s3, %s1304_s15 }
  0x12   : > { %v742_v6 = vld [vmem:[%s510_s23] sm:$0xff]  ;;  %v560_v7 = vcombine.high %v558_v5, %v558_v5  ;;  %s530_s18 = scalar_lea.vmem %s1568_s4, %s1304_s15  ;;  %s1309_s23 = sshll.u32 %s1579_s30, 5 }
  0x13   : > { %v744_v8 = vcombine.high %v742_v6, %v742_v6  ;;  %v554_v9 = vld [vmem:[%s490_s28] sm:$0xff]  ;;  %s540_s26 = scalar_lea.vmem %s1572_s8, %s1309_s23  ;;  %s550_s28 = scalar_lea.vmem %s1573_s9, %s1309_s23 }
  0x14   : > { %v839_v10 = vld [vmem:[%s520_s14] sm:$0xff]  ;;  %v651_v12 = vcombine.high %v554_v9, %v554_v9  ;;  %1276 = vmatprep.subr.msk.mxu1 %vm568_vm0, %v560_v7  ;;  %v1067_v47 = vld [vmem:[%s540_s26 + $0x8] sm:$0xff]  ;;  %v1068_v56 = vld [vmem:[%s540_s26 + $0x10] sm:$0xff] }
  0x15   : > { %v841_v13 = vcombine.high %v839_v10, %v839_v10  ;;  %1286 = vmatprep.subr.msk.mxu0 %vm568_vm0, %v744_v8  ;;  %v936_v15 = vld [vmem:[%s530_s18] sm:$0xff]  ;;  %1277 = vmatpush1.msk.msra.mxu1 %vm568_vm0, %v558_v5  ;;  %v1069_v58 = vld [vmem:[%s540_s26 + $0x18] sm:$0xff] }
  0x16   : > { %1287 = vmatpush1.msk.msra.mxu0 %vm568_vm0, %v742_v6  ;;  %1278 = vmatmul.mubr.msk.f32.vlgmr.msra.gmra.mrb[0].mxu1 %vm561_vm1, %v1274_v11  ;;  %v938_v17 = vcombine.high %v936_v15, %v936_v15  ;;  %v1066_v43 = vld [vmem:[%s540_s26] sm:$0xff] }
  0x17   : > { %1280 = vmatprep.subr.msk.mxu1 %vm568_vm0, %v651_v12  ;;  %1288 = vmatmul.mubr.msk.f32.vlgmr.msra.gmra.mrb[0].mxu0 %vm561_vm1, %v1284_v14 }
  0x18   : > { %1292 = vmatprep.subr.msk.mxu0 %vm568_vm0, %v841_v13  ;;  %1281 = vmatpush1.msk.msra.mxu1 %vm568_vm0, %v554_v9 }
  0x19   : > { %1293 = vmatpush1.msk.msra.mxu0 %vm568_vm0, %v839_v10  ;;  %643 = vmatprep.mubr.f32.mxu1 %v1386_v0 }
  0x1a   : > { %916 = vmatprep.mubr.f32.mxu0 %v1386_v0  ;;  %1279 = vmatmul.mubr.msk.f32.gmra.mrb[2].mxu1 %vm561_vm1, %v1275_v16 }
  0x1b   : > { %1311 = vmatprep.subr.msk.mxu1 %vm568_vm0, %v744_v8  ;;  %726 = vmatprep.mubr.f32.mxu1 %v1386_v0 }
  0x1c   : > { %1298 = vmatprep.subr.msk.mxu0 %vm568_vm0, %v938_v17 }
  0x1e   : > { %1282 = vmatmul.mubr.msk.f32.vlgmr.msra.gmra.mrb[0].mxu1 %vm561_vm1, %v552_v19 }
  0x1f   : > { %1294 = vmatmul.mubr.msk.f32.vlgmr.msra.gmra.mrb[0].mxu0 %vm561_vm1, %v1290_v20  ;;  %1312 = vmatpush1.msk.msra.mxu1 %vm568_vm0, %v742_v6 }
  0x20   : > { %1299 = vmatpush1.msk.msra.mxu0 %vm568_vm0, %v936_v15  ;;  %732 = vmatprep.mubr.f32.mxu1 %v1386_v0 }
  0x21   : > { %922 = vmatprep.mubr.f32.mxu0 %v1386_v0 }
  0x22   : > { %1283 = vmatmul.mubr.msk.f32.gmra.mrb[2].mxu1 %vm561_vm1, %v553_v21 }
  0x23   : > { %1295 = vmatmul.mubr.msk.f32.gmra.mrb[2].mxu0 %vm561_vm1, %v1291_v22  ;;  %825 = vmatprep.mubr.f32.mxu1 %v1386_v0 }
  0x24   : > { %1013 = vmatprep.mubr.f32.mxu0 %v1386_v0 }
  0x27   : > { %1300 = vmatmul.mubr.msk.f32.vlgmr.msra.gmra.mrb[0].mxu0 %vm561_vm1, %v1296_v23 }
  0x28   : > { %1019 = vmatprep.mubr.f32.mxu0 %v1386_v0 }
  0x2a   : > { %1289 = vmatmul.mubr.msk.f32.vlgmr.msra.gmra.mrb[2].mxu1 %vm561_vm1, %v1285_v24 }
  0x2b   : > { %1301 = vmatmul.mubr.msk.f32.gmra.mrb[2].mxu0 %vm561_vm1, %v1297_v25 }
  0x88   : > { %v1035_v28 = vpop.permute.xlu0 %1034  ;;  %v1051_v33 = vpop.permute.xlu1 %1050 }
  0x8c   : > { %v1040_v44 = vpop.permute.xlu0 %1039  ;;  %v1056_v50 = vpop.permute.xlu1 %1055 }
  0xf1   : > { %v728_v26 = vpop.f32.mrb[0].mxu1 }
  0xf2   : > { %v730_v27 = vpop.f32.mrb[1].mxu1 }
  0xfa   : > { %v1015_v29 = vpop.f32.mrb[0].mxu0 }
  0xfb   : > { %v1313_v30 = vadd.f32 %v1015_v29, %v728_v26  ;;  %v1017_v31 = vpop.f32.mrb[1].mxu0 }
  0xfc   : > { %v1314_v32 = vadd.f32 %v1017_v31, %v730_v27 }
  0xfd   : > { %v1042_v34 = vmul.f32 %v1313_v30, %v1035_v28  ;;  %v827_v35 = vpop.f32.mrb[2].mxu1 }
  0xfe   : > { %v1043_v36 = vmul.f32 %v1314_v32, %v1035_v28  ;;  %v1021_v37 = vpop.f32.mrb[2].mxu0  ;;  %v829_v38 = vpop.f32.mrb[3].mxu1 }
  0xff   : > { %v1058_v39 = vadd.f32 %v1051_v33, %v1042_v34  ;;  %v1315_v40 = vadd.f32 %v1021_v37, %v827_v35  ;;  %v1023_v41 = vpop.f32.mrb[3].mxu0 }
 0x100   : > { %v1059_v42 = vadd.f32 %v1051_v33, %v1043_v36  ;;  %v1316_v45 = vadd.f32 %v1023_v41, %v829_v38 }
 0x101   : > { %v1062_v46 = vmax.f32 %v1058_v39, 0.0  ;;  %v1044_v48 = vmul.f32 %v1315_v40, %v1040_v44 }
 0x102   : > { %v1063_v49 = vmax.f32 %v1059_v42, 0.0  ;;  %v1045_v51 = vmul.f32 %v1316_v45, %v1040_v44 }
 0x103   : > { %v1070_v52 = vadd.f32 %v1066_v43, %v1062_v46  ;;  %v1060_v53 = vadd.f32 %v1056_v50, %v1044_v48 }
 0x104   : > { %v1071_v54 = vadd.f32 %v1067_v47, %v1063_v49  ;;  %v1061_v55 = vadd.f32 %v1056_v50, %v1045_v51 }
 0x105   : > { %1074 = vst [vmem:[%s550_s28] sm:$0xff] %v1070_v52  ;;  %v1064_v57 = vmax.f32 %v1060_v53, 0.0 }
 0x106   : > { %1075 = vst [vmem:[%s550_s28 + $0x8] sm:$0xff] %v1071_v54  ;;  %v1065_v59 = vmax.f32 %v1061_v55, 0.0 }
 0x107   : > { %v1072_v60 = vadd.f32 %v1068_v56, %v1064_v57 }
 0x108   : > { %v1073_v61 = vadd.f32 %v1069_v58, %v1065_v59 }
 0x109   : > { %1076 = vst [vmem:[%s550_s28 + $0x10] sm:$0xff] %v1072_v60 }
 0x10a   : > { %1077 = vst [vmem:[%s550_s28 + $0x18] sm:$0xff] %v1073_v61 }
 0x10b PF: > { %s19_s11 = sadd.s32 1, %s1384_s11   ;;  %s1574_s30 = smov %s1380_s10 }
 0x10c   : > { %p16_p5 = scmp.ge.s32.totalorder %s19_s11, 4   ;;  %s1575_s10 = smov %s1577_s12 }
 0x10e   :  { %18 = sbr.rel (!%p16_p5) target bundleno = 2 (0x2), region = 105 }

</bundles_post_ra>
